<compile_context>
chip_gen: v6e
topology: v6e:2x2x1
jax: 0.10.0
libtpu: 0.0.40
codegen_flags: <defaults>
</compile_context>

<pallas_src>
import numpy as np

import jax
import jax.numpy as jnp
from jax.experimental import pallas as pl
from jax.experimental.pallas import tpu as pltpu


def _ceil_to(x, m):
    return -(-x // m) * m


# ----------------------------------------------------------------------------
# Fused Pallas kernel (all LSTM layers + decoder + mask)
# ----------------------------------------------------------------------------

def make_fused_kernel(num_layers, T, BP, H, D):
    """Build the fused ProbLSTM forward kernel for static sizes."""
    TB = T * BP
    Tm1 = T - 1
    Dmax = max(D, H)
    Kp = _ceil_to(Dmax + H + 1, 8)          # rows per layer block in the weight slab
    off_c0 = _ceil_to(num_layers, 8)        # misc-slab row offsets
    off_dw = 2 * off_c0
    off_db = off_dw + H

    def kernel(im_ref, wpack_ref, misc_ref, out_ref):
        # im_ref   : (TB, 2) i32   col 0 = char index for row r = t*BP + b
        #                          col 1 = keep flag (1 iff t < str_lens[b]-1), rows < Tm1*BP
        # wpack_ref: (L*Kp, 4H) f32  per layer: [W_ih^T (padded to Dmax rows); W_hh^T; bias; pad]
        # misc_ref : (R, Dmax) f32   [h0 ; pad ; c0 ; pad ; dec_w^T ; dec_b ; pad]
        # out_ref  : (Tm1*BP, D) f32 log-probs, masked positions zeroed

        # Layer-0 one-hot built in-register from indices (no HBM one-hot); exact in bf16.
        idx_col = im_ref[:, 0:1]
        lane = jax.lax.broadcasted_iota(jnp.int32, (TB, D), 1)
        x_in = (lane == idx_col).astype(jnp.bfloat16)                      # (TB, D)

        hs = None
        for l in range(num_layers):
            din = D if l == 0 else H
            r0 = l * Kp
            # Deliberate bf16 MXU operands (single pass), f32 accumulation.
            w_ih = wpack_ref[r0:r0 + din, :].astype(jnp.bfloat16)           # (din, 4H)
            w_hh = wpack_ref[r0 + Dmax:r0 + Dmax + H, :].astype(jnp.bfloat16)  # (H, 4H)
            bias = wpack_ref[r0 + Dmax + H:r0 + Dmax + H + 1, :]            # (1, 4H) f32

            # Hoisted input-to-gates matmul for all T*B rows; bias folded once.
            gx = jnp.dot(x_in, w_ih,
                         preferred_element_type=jnp.float32) + bias         # (TB, 4H) f32
            # NOTE: gx (64x128 f32) pins ~8 vregs across the unrolled loop -- fine at
            # T=8/H=32; spill to VMEM scratch if T or H grows.

            h = jnp.broadcast_to(misc_ref[l:l + 1, 0:H], (BP, H))           # learned init_h
            c = jnp.broadcast_to(misc_ref[off_c0 + l:off_c0 + l + 1, 0:H], (BP, H))

            hs = []
            for t in range(T):                       # fully unrolled recurrence
                # W_hh is loop-invariant: Mosaic keeps the MXU weight push hoisted
                # across the unrolled steps (explicit push/acc/pop path is a TODO).
                g = gx[t * BP:(t + 1) * BP, :] + jnp.dot(
                    h.astype(jnp.bfloat16), w_hh,
                    preferred_element_type=jnp.float32)                      # (BP, 4H)
                sig = jax.nn.sigmoid(g)              # full-width EUP, slice after
                tnh = jnp.tanh(g)
                i_g = sig[:, 0:H]
                f_g = sig[:, H:2 * H]
                g_g = tnh[:, 2 * H:3 * H]
                o_g = sig[:, 3 * H:4 * H]
                c = f_g * c + i_g * g_g
                h = o_g * jnp.tanh(c)
                hs.append(h)                         # stays in registers (no seq scratch)

            if l < num_layers - 1:
                # Next layer's input assembled in-register: no VMEM store/reload
                # round-trip at the layer boundary.
                x_in = jnp.concatenate(hs, axis=0).astype(jnp.bfloat16)      # (TB, H)

        # Decoder over seq_out[:-1]: one matmul + one log-softmax + masked store.
        dec_w = misc_ref[off_dw:off_dw + H, 0:D].astype(jnp.bfloat16)        # (H, D)
        dec_b = misc_ref[off_db:off_db + 1, 0:D]                             # (1, D)
        seq_dec = jnp.concatenate(hs[:Tm1], axis=0).astype(jnp.bfloat16)     # (Tm1*BP, H)
        logits = jnp.dot(seq_dec, dec_w,
                         preferred_element_type=jnp.float32) + dec_b
        m = jnp.max(logits, axis=-1, keepdims=True)
        z = logits - m
        logp = z - jnp.log(jnp.sum(jnp.exp(z), axis=-1, keepdims=True))

        # too_long mask precomputed in the wrapper (no lens scratch, no tiling loop).
        keep = im_ref[0:Tm1 * BP, 1:2] > 0                                   # (Tm1*BP, 1)
        out_ref[...] = jnp.where(keep, logp, 0.0)

    return kernel


# ----------------------------------------------------------------------------
# Parameter init (deterministic, mirrors module __init__ shapes)
# ----------------------------------------------------------------------------

def init_params(key, input_size, hidden_size, num_layers):
    initrange = 0.1
    keys = iter(jax.random.split(key, 4 * num_layers + 4))

    def uni(k, shape):
        return jax.random.uniform(k, shape, jnp.float32, -initrange, initrange)

    wih, whh, bias = [], [], []
    for l in range(num_layers):
        din = input_size if l == 0 else hidden_size
        wih.append(uni(next(keys), (din, 4 * hidden_size)))          # weight_ih.T
        whh.append(uni(next(keys), (hidden_size, 4 * hidden_size)))  # weight_hh.T
        b_ih = uni(next(keys), (1, 4 * hidden_size))
        b_hh = uni(next(keys), (1, 4 * hidden_size))
        bias.append(b_ih + b_hh)
    init_h = uni(next(keys), (num_layers, 1, hidden_size))
    init_c = uni(next(keys), (num_layers, 1, hidden_size))
    dec_w = uni(next(keys), (hidden_size, input_size))               # Linear weight.T
    dec_b = uni(next(keys), (1, input_size))
    return dict(wih=wih, whh=whh, bias=bias, init_h=init_h, init_c=init_c,
                dec_w=dec_w, dec_b=dec_b)


# ----------------------------------------------------------------------------
# One-time packing of parameters into 2 DMA-friendly slabs
# ----------------------------------------------------------------------------

def pack_params(params, input_size):
    D = input_size
    H = params['whh'][0].shape[0]
    L = len(params['wih'])
    Dmax = max(D, H)
    Kp = _ceil_to(Dmax + H + 1, 8)

    wpack = jnp.zeros((L * Kp, 4 * H), jnp.float32)
    for l in range(L):
        din = D if l == 0 else H
        r0 = l * Kp
        wpack = wpack.at[r0:r0 + din, :].set(params['wih'][l])
        wpack = wpack.at[r0 + Dmax:r0 + Dmax + H, :].set(params['whh'][l])
        wpack = wpack.at[r0 + Dmax + H, :].set(params['bias'][l][0])

    off_c0 = _ceil_to(L, 8)
    off_dw = 2 * off_c0
    off_db = off_dw + H
    R = _ceil_to(off_db + 1, 8)
    misc = jnp.zeros((R, Dmax), jnp.float32)
    misc = misc.at[0:L, 0:H].set(params['init_h'][:, 0, :])
    misc = misc.at[off_c0:off_c0 + L, 0:H].set(params['init_c'][:, 0, :])
    misc = misc.at[off_dw:off_dw + H, 0:D].set(params['dec_w'])
    misc = misc.at[off_db, 0:D].set(params['dec_b'][0])

    return dict(wpack=wpack, misc=misc, D=D, H=H, L=L)


# ----------------------------------------------------------------------------
# Forward (single fused pallas_call; only tiny packing/slicing glue in JAX)
# ----------------------------------------------------------------------------

def prob_lstm_forward(index_mat, str_lens, packed):
    """index_mat: (B, T) int; str_lens: (B,) int -> (T-1, B, input_size) log-probs."""
    D, H, L = packed['D'], packed['H'], packed['L']
    idx = index_mat.T.astype(jnp.int32)                     # (T, B)  [strset2tor]
    T, B = idx.shape
    BP = _ceil_to(B, 8)                                     # pad batch to sublane tile
    Tm1 = T - 1
    TB = T * BP

    # Packed int column: col 0 = flattened index (row r = t*BP + b),
    # col 1 = keep flag (1 iff t < str_lens[b]-1); padded rows/cols are 0.
    idx_p = jnp.zeros((T, BP), jnp.int32).at[:, :B].set(idx)
    t_ix = jnp.arange(Tm1, dtype=jnp.int32)[:, None]
    keep = (t_ix < (str_lens.astype(jnp.int32)[None, :] - 1)).astype(jnp.int32)
    keep_p = jnp.zeros((T, BP), jnp.int32).at[:Tm1, :B].set(keep)
    im = jnp.stack([idx_p.reshape(TB), keep_p.reshape(TB)], axis=1)      # (TB, 2)

    inputs = [im, packed['wpack'], packed['misc']]

    # Advisory cost estimate for the fused call.
    flops = (2 * TB * D * 4 * H                              # layer-0 gates_x
             + 2 * TB * H * 4 * H * max(L - 1, 0)            # deeper-layer gates_x
             + 2 * BP * H * 4 * H * T * L                    # recurrent h @ W_hh
             + 2 * Tm1 * BP * H * D)                         # decoder matmul
    transcendentals = L * T * BP * 9 * H + Tm1 * BP * (D + 1)
    bytes_accessed = int(sum(int(x.size) * x.dtype.itemsize for x in inputs)
                         + Tm1 * BP * D * 4)

    kernel = make_fused_kernel(L, T, BP, H, D)
    out2 = pl.pallas_call(
        kernel,
        out_shape=jax.ShapeDtypeStruct((Tm1 * BP, D), jnp.float32),
        in_specs=[pl.BlockSpec(memory_space=pltpu.MemorySpace.VMEM)] * len(inputs),
        out_specs=pl.BlockSpec(memory_space=pltpu.MemorySpace.VMEM),
        # vmem_limit_bytes intentionally not set: resident data is well under the
        # default scoped VMEM on v5e/v6e/v7x at these shapes.
        cost_estimate=pl.CostEstimate(flops=int(flops),
                                      transcendentals=int(transcendentals),
                                      bytes_accessed=bytes_accessed),
    )(*inputs)

    return out2.reshape(Tm1, BP, D)[:, :B, :]                # drop batch padding


# ----------------------------------------------------------------------------
# Pure-numpy reference (for correctness check only)
# ----------------------------------------------------------------------------

def ref_forward(index_mat, str_lens, params, input_size):
    idx = np.asarray(index_mat).T
    T, B = idx.shape
    seq = np.eye(input_size, dtype=np.float32)[idx]          # (T, B, D)
    sig = lambda v: 1.0 / (1.0 + np.exp(-v))
    for l in range(len(params['wih'])):
        wih = np.asarray(params['wih'][l])
        whh = np.asarray(params['whh'][l])
        b = np.asarray(params['bias'][l])
        H = whh.shape[0]
        h = np.broadcast_to(np.asarray(params['init_h'][l]), (B, H)).copy()
        c = np.broadcast_to(np.asarray(params['init_c'][l]), (B, H)).copy()
        outs = []
        for t in range(T):
            gates = seq[t] @ wih + h @ whh + b
            i = sig(gates[:, :H]); f = sig(gates[:, H:2 * H])
            g = np.tanh(gates[:, 2 * H:3 * H]); o = sig(gates[:, 3 * H:4 * H])
            c = f * c + i * g
            h = o * np.tanh(c)
            outs.append(h)
        seq = np.stack(outs)
    seq = seq[:-1]
    logits = seq @ np.asarray(params['dec_w']) + np.asarray(params['dec_b'])
    m = logits.max(-1, keepdims=True)
    z = logits - m
    logp = z - np.log(np.exp(z).sum(-1, keepdims=True))
    lens = np.asarray(str_lens) - 1
    Tm1 = T - 1
    too_long = np.arange(Tm1)[:, None] >= lens[None, :]
    return np.where(too_long[..., None], 0.0, logp).astype(np.float32)


# ----------------------------------------------------------------------------
# Main
# ----------------------------------------------------------------------------

if __name__ == "__main__":
    input_size, hidden_size, num_layers = 16, 32, 2
    B, T = 4, 8                                   # batch strings, max_len (incl. BOS/EOS)

    key = jax.random.PRNGKey(0)
    k_param, k_data = jax.random.split(key)
    params = init_params(k_param, input_size, hidden_size, num_layers)
    packed = pack_params(params, input_size)

    # Deterministic synthetic StrSet: index_mat (B, T), str_lens (B,)
    body = jax.random.randint(k_data, (B, T), 0, input_size - 2)
    index_mat = body.at[:, 0].set(input_size - 2)                  # BOS at position 0
    str_lens = jnp.array([8, 6, 5, 8], dtype=jnp.int32)
    index_mat = index_mat.at[jnp.arange(B), str_lens - 1].set(input_size - 1)  # EOS

    out = prob_lstm_forward(index_mat, str_lens, packed)
    out = jax.block_until_ready(out)

    assert out.shape == (T - 1, B, input_size)
    ref = ref_forward(index_mat, str_lens, params, input_size)
    # Tolerance accounts for the deliberate bf16 MXU operands (f32 accumulation).
    np.testing.assert_allclose(np.asarray(out), ref, atol=5e-3, rtol=5e-3)

    print("KERNEL_OK")
</pallas_src>

<mosaic_0001>
module attributes {stable_mosaic.version = 11 : i64} {
  func.func @kernel(%arg0: memref<64x2xi32, #tpu.memory_space<vmem>>, %arg1: memref<144x128xf32, #tpu.memory_space<vmem>>, %arg2: memref<56x32xf32, #tpu.memory_space<vmem>>, %arg3: memref<56x16xf32, #tpu.memory_space<vmem>>) attributes {dimension_semantics = [], scalar_prefetch = 0 : i64, scratch_operands = 0 : i64, tpu.core_type = #tpu.core_type<tc>} {
    %c0 = arith.constant 0 : index
    %c0_0 = arith.constant 0 : index
    %0 = vector.load %arg0[%c0, %c0_0] : memref<64x2xi32, #tpu.memory_space<vmem>>, vector<64x1xi32>
    %1 = tpu.iota {dimensions = array<i32: 1>} : vector<64x16xi32>
    %2 = vector.broadcast %0 : vector<64x1xi32> to vector<64x16xi32>
    %3 = arith.cmpi eq, %1, %2 : vector<64x16xi32>
    %4 = arith.extui %3 : vector<64x16xi1> to vector<64x16xi32>
    %5 = arith.sitofp %4 : vector<64x16xi32> to vector<64x16xf32>
    %6 = arith.truncf %5 : vector<64x16xf32> to vector<64x16xbf16>
    %c0_1 = arith.constant 0 : index
    %c0_2 = arith.constant 0 : index
    %7 = vector.load %arg1[%c0_1, %c0_2] : memref<144x128xf32, #tpu.memory_space<vmem>>, vector<16x128xf32>
    %8 = arith.truncf %7 : vector<16x128xf32> to vector<16x128xbf16>
    %c32 = arith.constant 32 : index
    %c0_3 = arith.constant 0 : index
    %9 = vector.load %arg1[%c32, %c0_3] : memref<144x128xf32, #tpu.memory_space<vmem>>, vector<32x128xf32>
    %10 = arith.truncf %9 : vector<32x128xf32> to vector<32x128xbf16>
    %c64 = arith.constant 64 : index
    %c0_4 = arith.constant 0 : index
    %11 = vector.load %arg1[%c64, %c0_4] : memref<144x128xf32, #tpu.memory_space<vmem>>, vector<1x128xf32>
    %cst = arith.constant dense<0.000000e+00> : vector<64x128xf32>
    %12 = tpu.matmul %6, %8, %cst {dimension_numbers = #tpu.dot_dimension_numbers<[1], [0], [0], [1], [0, 0, 1, 1], [], []>} : vector<64x16xbf16>, vector<16x128xbf16>, vector<64x128xf32> -> vector<64x128xf32>
    %13 = vector.broadcast %11 : vector<1x128xf32> to vector<64x128xf32>
    %14 = arith.addf %12, %13 : vector<64x128xf32>
    %c0_5 = arith.constant 0 : index
    %c0_6 = arith.constant 0 : index
    %15 = vector.load %arg2[%c0_5, %c0_6] : memref<56x32xf32, #tpu.memory_space<vmem>>, vector<1x32xf32>
    %16 = vector.shape_cast %15 : vector<1x32xf32> to vector<1x32xf32>
    %17 = vector.broadcast %16 : vector<1x32xf32> to vector<8x32xf32>
    %c8 = arith.constant 8 : index
    %c0_7 = arith.constant 0 : index
    %18 = vector.load %arg2[%c8, %c0_7] : memref<56x32xf32, #tpu.memory_space<vmem>>, vector<1x32xf32>
    %19 = vector.shape_cast %18 : vector<1x32xf32> to vector<1x32xf32>
    %20 = vector.broadcast %19 : vector<1x32xf32> to vector<8x32xf32>
    %21 = vector.extract_strided_slice %14 {offsets = [0, 0], sizes = [8, 128], strides = [1, 1]} : vector<64x128xf32> to vector<8x128xf32>
    %22 = arith.truncf %17 : vector<8x32xf32> to vector<8x32xbf16>
    %cst_8 = arith.constant dense<0.000000e+00> : vector<8x128xf32>
    %23 = tpu.matmul %22, %10, %cst_8 {dimension_numbers = #tpu.dot_dimension_numbers<[1], [0], [0], [1], [0, 0, 1, 1], [], []>} : vector<8x32xbf16>, vector<32x128xbf16>, vector<8x128xf32> -> vector<8x128xf32>
    %24 = arith.addf %21, %23 : vector<8x128xf32>
    %25 = arith.negf %24 : vector<8x128xf32>
    %26 = math.exp %25 : vector<8x128xf32>
    %cst_9 = arith.constant 1.000000e+00 : f32
    %27 = vector.broadcast %cst_9 : f32 to vector<8x128xf32>
    %28 = arith.addf %27, %26 : vector<8x128xf32>
    %29 = arith.divf %27, %28 : vector<8x128xf32>
    %30 = math.tanh %24 : vector<8x128xf32>
    %31 = vector.extract_strided_slice %29 {offsets = [0, 0], sizes = [8, 32], strides = [1, 1]} : vector<8x128xf32> to vector<8x32xf32>
    %32 = vector.extract_strided_slice %29 {offsets = [0, 32], sizes = [8, 32], strides = [1, 1]} : vector<8x128xf32> to vector<8x32xf32>
    %33 = vector.extract_strided_slice %30 {offsets = [0, 64], sizes = [8, 32], strides = [1, 1]} : vector<8x128xf32> to vector<8x32xf32>
    %34 = vector.extract_strided_slice %29 {offsets = [0, 96], sizes = [8, 32], strides = [1, 1]} : vector<8x128xf32> to vector<8x32xf32>
    %35 = arith.mulf %32, %20 : vector<8x32xf32>
    %36 = arith.mulf %31, %33 : vector<8x32xf32>
    %37 = arith.addf %35, %36 : vector<8x32xf32>
    %38 = math.tanh %37 : vector<8x32xf32>
    %39 = arith.mulf %34, %38 : vector<8x32xf32>
    %40 = vector.extract_strided_slice %14 {offsets = [8, 0], sizes = [8, 128], strides = [1, 1]} : vector<64x128xf32> to vector<8x128xf32>
    %41 = arith.truncf %39 : vector<8x32xf32> to vector<8x32xbf16>
    %cst_10 = arith.constant dense<0.000000e+00> : vector<8x128xf32>
    %42 = tpu.matmul %41, %10, %cst_10 {dimension_numbers = #tpu.dot_dimension_numbers<[1], [0], [0], [1], [0, 0, 1, 1], [], []>} : vector<8x32xbf16>, vector<32x128xbf16>, vector<8x128xf32> -> vector<8x128xf32>
    %43 = arith.addf %40, %42 : vector<8x128xf32>
    %44 = arith.negf %43 : vector<8x128xf32>
    %45 = math.exp %44 : vector<8x128xf32>
    %cst_11 = arith.constant 1.000000e+00 : f32
    %46 = vector.broadcast %cst_11 : f32 to vector<8x128xf32>
    %47 = arith.addf %46, %45 : vector<8x128xf32>
    %48 = arith.divf %46, %47 : vector<8x128xf32>
    %49 = math.tanh %43 : vector<8x128xf32>
    %50 = vector.extract_strided_slice %48 {offsets = [0, 0], sizes = [8, 32], strides = [1, 1]} : vector<8x128xf32> to vector<8x32xf32>
    %51 = vector.extract_strided_slice %48 {offsets = [0, 32], sizes = [8, 32], strides = [1, 1]} : vector<8x128xf32> to vector<8x32xf32>
    %52 = vector.extract_strided_slice %49 {offsets = [0, 64], sizes = [8, 32], strides = [1, 1]} : vector<8x128xf32> to vector<8x32xf32>
    %53 = vector.extract_strided_slice %48 {offsets = [0, 96], sizes = [8, 32], strides = [1, 1]} : vector<8x128xf32> to vector<8x32xf32>
    %54 = arith.mulf %51, %37 : vector<8x32xf32>
    %55 = arith.mulf %50, %52 : vector<8x32xf32>
    %56 = arith.addf %54, %55 : vector<8x32xf32>
    %57 = math.tanh %56 : vector<8x32xf32>
    %58 = arith.mulf %53, %57 : vector<8x32xf32>
    %59 = vector.extract_strided_slice %14 {offsets = [16, 0], sizes = [8, 128], strides = [1, 1]} : vector<64x128xf32> to vector<8x128xf32>
    %60 = arith.truncf %58 : vector<8x32xf32> to vector<8x32xbf16>
    %cst_12 = arith.constant dense<0.000000e+00> : vector<8x128xf32>
    %61 = tpu.matmul %60, %10, %cst_12 {dimension_numbers = #tpu.dot_dimension_numbers<[1], [0], [0], [1], [0, 0, 1, 1], [], []>} : vector<8x32xbf16>, vector<32x128xbf16>, vector<8x128xf32> -> vector<8x128xf32>
    %62 = arith.addf %59, %61 : vector<8x128xf32>
    %63 = arith.negf %62 : vector<8x128xf32>
    %64 = math.exp %63 : vector<8x128xf32>
    %cst_13 = arith.constant 1.000000e+00 : f32
    %65 = vector.broadcast %cst_13 : f32 to vector<8x128xf32>
    %66 = arith.addf %65, %64 : vector<8x128xf32>
    %67 = arith.divf %65, %66 : vector<8x128xf32>
    %68 = math.tanh %62 : vector<8x128xf32>
    %69 = vector.extract_strided_slice %67 {offsets = [0, 0], sizes = [8, 32], strides = [1, 1]} : vector<8x128xf32> to vector<8x32xf32>
    %70 = vector.extract_strided_slice %67 {offsets = [0, 32], sizes = [8, 32], strides = [1, 1]} : vector<8x128xf32> to vector<8x32xf32>
    %71 = vector.extract_strided_slice %68 {offsets = [0, 64], sizes = [8, 32], strides = [1, 1]} : vector<8x128xf32> to vector<8x32xf32>
    %72 = vector.extract_strided_slice %67 {offsets = [0, 96], sizes = [8, 32], strides = [1, 1]} : vector<8x128xf32> to vector<8x32xf32>
    %73 = arith.mulf %70, %56 : vector<8x32xf32>
    %74 = arith.mulf %69, %71 : vector<8x32xf32>
    %75 = arith.addf %73, %74 : vector<8x32xf32>
    %76 = math.tanh %75 : vector<8x32xf32>
    %77 = arith.mulf %72, %76 : vector<8x32xf32>
    %78 = vector.extract_strided_slice %14 {offsets = [24, 0], sizes = [8, 128], strides = [1, 1]} : vector<64x128xf32> to vector<8x128xf32>
    %79 = arith.truncf %77 : vector<8x32xf32> to vector<8x32xbf16>
    %cst_14 = arith.constant dense<0.000000e+00> : vector<8x128xf32>
    %80 = tpu.matmul %79, %10, %cst_14 {dimension_numbers = #tpu.dot_dimension_numbers<[1], [0], [0], [1], [0, 0, 1, 1], [], []>} : vector<8x32xbf16>, vector<32x128xbf16>, vector<8x128xf32> -> vector<8x128xf32>
    %81 = arith.addf %78, %80 : vector<8x128xf32>
    %82 = arith.negf %81 : vector<8x128xf32>
    %83 = math.exp %82 : vector<8x128xf32>
    %cst_15 = arith.constant 1.000000e+00 : f32
    %84 = vector.broadcast %cst_15 : f32 to vector<8x128xf32>
    %85 = arith.addf %84, %83 : vector<8x128xf32>
    %86 = arith.divf %84, %85 : vector<8x128xf32>
    %87 = math.tanh %81 : vector<8x128xf32>
    %88 = vector.extract_strided_slice %86 {offsets = [0, 0], sizes = [8, 32], strides = [1, 1]} : vector<8x128xf32> to vector<8x32xf32>
    %89 = vector.extract_strided_slice %86 {offsets = [0, 32], sizes = [8, 32], strides = [1, 1]} : vector<8x128xf32> to vector<8x32xf32>
    %90 = vector.extract_strided_slice %87 {offsets = [0, 64], sizes = [8, 32], strides = [1, 1]} : vector<8x128xf32> to vector<8x32xf32>
    %91 = vector.extract_strided_slice %86 {offsets = [0, 96], sizes = [8, 32], strides = [1, 1]} : vector<8x128xf32> to vector<8x32xf32>
    %92 = arith.mulf %89, %75 : vector<8x32xf32>
    %93 = arith.mulf %88, %90 : vector<8x32xf32>
    %94 = arith.addf %92, %93 : vector<8x32xf32>
    %95 = math.tanh %94 : vector<8x32xf32>
    %96 = arith.mulf %91, %95 : vector<8x32xf32>
    %97 = vector.extract_strided_slice %14 {offsets = [32, 0], sizes = [8, 128], strides = [1, 1]} : vector<64x128xf32> to vector<8x128xf32>
    %98 = arith.truncf %96 : vector<8x32xf32> to vector<8x32xbf16>
    %cst_16 = arith.constant dense<0.000000e+00> : vector<8x128xf32>
    %99 = tpu.matmul %98, %10, %cst_16 {dimension_numbers = #tpu.dot_dimension_numbers<[1], [0], [0], [1], [0, 0, 1, 1], [], []>} : vector<8x32xbf16>, vector<32x128xbf16>, vector<8x128xf32> -> vector<8x128xf32>
    %100 = arith.addf %97, %99 : vector<8x128xf32>
    %101 = arith.negf %100 : vector<8x128xf32>
    %102 = math.exp %101 : vector<8x128xf32>
    %cst_17 = arith.constant 1.000000e+00 : f32
    %103 = vector.broadcast %cst_17 : f32 to vector<8x128xf32>
    %104 = arith.addf %103, %102 : vector<8x128xf32>
    %105 = arith.divf %103, %104 : vector<8x128xf32>
    %106 = math.tanh %100 : vector<8x128xf32>
    %107 = vector.extract_strided_slice %105 {offsets = [0, 0], sizes = [8, 32], strides = [1, 1]} : vector<8x128xf32> to vector<8x32xf32>
    %108 = vector.extract_strided_slice %105 {offsets = [0, 32], sizes = [8, 32], strides = [1, 1]} : vector<8x128xf32> to vector<8x32xf32>
    %109 = vector.extract_strided_slice %106 {offsets = [0, 64], sizes = [8, 32], strides = [1, 1]} : vector<8x128xf32> to vector<8x32xf32>
    %110 = vector.extract_strided_slice %105 {offsets = [0, 96], sizes = [8, 32], strides = [1, 1]} : vector<8x128xf32> to vector<8x32xf32>
    %111 = arith.mulf %108, %94 : vector<8x32xf32>
    %112 = arith.mulf %107, %109 : vector<8x32xf32>
    %113 = arith.addf %111, %112 : vector<8x32xf32>
    %114 = math.tanh %113 : vector<8x32xf32>
    %115 = arith.mulf %110, %114 : vector<8x32xf32>
    %116 = vector.extract_strided_slice %14 {offsets = [40, 0], sizes = [8, 128], strides = [1, 1]} : vector<64x128xf32> to vector<8x128xf32>
    %117 = arith.truncf %115 : vector<8x32xf32> to vector<8x32xbf16>
    %cst_18 = arith.constant dense<0.000000e+00> : vector<8x128xf32>
    %118 = tpu.matmul %117, %10, %cst_18 {dimension_numbers = #tpu.dot_dimension_numbers<[1], [0], [0], [1], [0, 0, 1, 1], [], []>} : vector<8x32xbf16>, vector<32x128xbf16>, vector<8x128xf32> -> vector<8x128xf32>
    %119 = arith.addf %116, %118 : vector<8x128xf32>
    %120 = arith.negf %119 : vector<8x128xf32>
    %121 = math.exp %120 : vector<8x128xf32>
    %cst_19 = arith.constant 1.000000e+00 : f32
    %122 = vector.broadcast %cst_19 : f32 to vector<8x128xf32>
    %123 = arith.addf %122, %121 : vector<8x128xf32>
    %124 = arith.divf %122, %123 : vector<8x128xf32>
    %125 = math.tanh %119 : vector<8x128xf32>
    %126 = vector.extract_strided_slice %124 {offsets = [0, 0], sizes = [8, 32], strides = [1, 1]} : vector<8x128xf32> to vector<8x32xf32>
    %127 = vector.extract_strided_slice %124 {offsets = [0, 32], sizes = [8, 32], strides = [1, 1]} : vector<8x128xf32> to vector<8x32xf32>
    %128 = vector.extract_strided_slice %125 {offsets = [0, 64], sizes = [8, 32], strides = [1, 1]} : vector<8x128xf32> to vector<8x32xf32>
    %129 = vector.extract_strided_slice %124 {offsets = [0, 96], sizes = [8, 32], strides = [1, 1]} : vector<8x128xf32> to vector<8x32xf32>
    %130 = arith.mulf %127, %113 : vector<8x32xf32>
    %131 = arith.mulf %126, %128 : vector<8x32xf32>
    %132 = arith.addf %130, %131 : vector<8x32xf32>
    %133 = math.tanh %132 : vector<8x32xf32>
    %134 = arith.mulf %129, %133 : vector<8x32xf32>
    %135 = vector.extract_strided_slice %14 {offsets = [48, 0], sizes = [8, 128], strides = [1, 1]} : vector<64x128xf32> to vector<8x128xf32>
    %136 = arith.truncf %134 : vector<8x32xf32> to vector<8x32xbf16>
    %cst_20 = arith.constant dense<0.000000e+00> : vector<8x128xf32>
    %137 = tpu.matmul %136, %10, %cst_20 {dimension_numbers = #tpu.dot_dimension_numbers<[1], [0], [0], [1], [0, 0, 1, 1], [], []>} : vector<8x32xbf16>, vector<32x128xbf16>, vector<8x128xf32> -> vector<8x128xf32>
    %138 = arith.addf %135, %137 : vector<8x128xf32>
    %139 = arith.negf %138 : vector<8x128xf32>
    %140 = math.exp %139 : vector<8x128xf32>
    %cst_21 = arith.constant 1.000000e+00 : f32
    %141 = vector.broadcast %cst_21 : f32 to vector<8x128xf32>
    %142 = arith.addf %141, %140 : vector<8x128xf32>
    %143 = arith.divf %141, %142 : vector<8x128xf32>
    %144 = math.tanh %138 : vector<8x128xf32>
    %145 = vector.extract_strided_slice %143 {offsets = [0, 0], sizes = [8, 32], strides = [1, 1]} : vector<8x128xf32> to vector<8x32xf32>
    %146 = vector.extract_strided_slice %143 {offsets = [0, 32], sizes = [8, 32], strides = [1, 1]} : vector<8x128xf32> to vector<8x32xf32>
    %147 = vector.extract_strided_slice %144 {offsets = [0, 64], sizes = [8, 32], strides = [1, 1]} : vector<8x128xf32> to vector<8x32xf32>
    %148 = vector.extract_strided_slice %143 {offsets = [0, 96], sizes = [8, 32], strides = [1, 1]} : vector<8x128xf32> to vector<8x32xf32>
    %149 = arith.mulf %146, %132 : vector<8x32xf32>
    %150 = arith.mulf %145, %147 : vector<8x32xf32>
    %151 = arith.addf %149, %150 : vector<8x32xf32>
    %152 = math.tanh %151 : vector<8x32xf32>
    %153 = arith.mulf %148, %152 : vector<8x32xf32>
    %154 = vector.extract_strided_slice %14 {offsets = [56, 0], sizes = [8, 128], strides = [1, 1]} : vector<64x128xf32> to vector<8x128xf32>
    %155 = arith.truncf %153 : vector<8x32xf32> to vector<8x32xbf16>
    %cst_22 = arith.constant dense<0.000000e+00> : vector<8x128xf32>
    %156 = tpu.matmul %155, %10, %cst_22 {dimension_numbers = #tpu.dot_dimension_numbers<[1], [0], [0], [1], [0, 0, 1, 1], [], []>} : vector<8x32xbf16>, vector<32x128xbf16>, vector<8x128xf32> -> vector<8x128xf32>
    %157 = arith.addf %154, %156 : vector<8x128xf32>
    %158 = arith.negf %157 : vector<8x128xf32>
    %159 = math.exp %158 : vector<8x128xf32>
    %cst_23 = arith.constant 1.000000e+00 : f32
    %160 = vector.broadcast %cst_23 : f32 to vector<8x128xf32>
    %161 = arith.addf %160, %159 : vector<8x128xf32>
    %162 = arith.divf %160, %161 : vector<8x128xf32>
    %163 = math.tanh %157 : vector<8x128xf32>
    %164 = vector.extract_strided_slice %162 {offsets = [0, 0], sizes = [8, 32], strides = [1, 1]} : vector<8x128xf32> to vector<8x32xf32>
    %165 = vector.extract_strided_slice %162 {offsets = [0, 32], sizes = [8, 32], strides = [1, 1]} : vector<8x128xf32> to vector<8x32xf32>
    %166 = vector.extract_strided_slice %163 {offsets = [0, 64], sizes = [8, 32], strides = [1, 1]} : vector<8x128xf32> to vector<8x32xf32>
    %167 = vector.extract_strided_slice %162 {offsets = [0, 96], sizes = [8, 32], strides = [1, 1]} : vector<8x128xf32> to vector<8x32xf32>
    %168 = arith.mulf %165, %151 : vector<8x32xf32>
    %169 = arith.mulf %164, %166 : vector<8x32xf32>
    %170 = arith.addf %168, %169 : vector<8x32xf32>
    %171 = math.tanh %170 : vector<8x32xf32>
    %172 = arith.mulf %167, %171 : vector<8x32xf32>
    %173 = tpu.concatenate %39, %58, %77, %96, %115, %134, %153, %172 in 0 : vector<8x32xf32>, vector<8x32xf32>, vector<8x32xf32>, vector<8x32xf32>, vector<8x32xf32>, vector<8x32xf32>, vector<8x32xf32>, vector<8x32xf32> -> vector<64x32xf32>
    %174 = arith.truncf %173 : vector<64x32xf32> to vector<64x32xbf16>
    %c72 = arith.constant 72 : index
    %c0_24 = arith.constant 0 : index
    %175 = vector.load %arg1[%c72, %c0_24] : memref<144x128xf32, #tpu.memory_space<vmem>>, vector<32x128xf32>
    %176 = arith.truncf %175 : vector<32x128xf32> to vector<32x128xbf16>
    %c104 = arith.constant 104 : index
    %c0_25 = arith.constant 0 : index
    %177 = vector.load %arg1[%c104, %c0_25] : memref<144x128xf32, #tpu.memory_space<vmem>>, vector<32x128xf32>
    %178 = arith.truncf %177 : vector<32x128xf32> to vector<32x128xbf16>
    %c136 = arith.constant 136 : index
    %c0_26 = arith.constant 0 : index
    %179 = vector.load %arg1[%c136, %c0_26] : memref<144x128xf32, #tpu.memory_space<vmem>>, vector<1x128xf32>
    %cst_27 = arith.constant dense<0.000000e+00> : vector<64x128xf32>
    %180 = tpu.matmul %174, %176, %cst_27 {dimension_numbers = #tpu.dot_dimension_numbers<[1], [0], [0], [1], [0, 0, 1, 1], [], []>} : vector<64x32xbf16>, vector<32x128xbf16>, vector<64x128xf32> -> vector<64x128xf32>
    %181 = vector.broadcast %179 : vector<1x128xf32> to vector<64x128xf32>
    %182 = arith.addf %180, %181 : vector<64x128xf32>
    %c1 = arith.constant 1 : index
    %c0_28 = arith.constant 0 : index
    %183 = vector.load %arg2[%c1, %c0_28] : memref<56x32xf32, #tpu.memory_space<vmem>>, vector<1x32xf32>
    %184 = vector.shape_cast %183 : vector<1x32xf32> to vector<1x32xf32>
    %185 = vector.broadcast %184 : vector<1x32xf32> to vector<8x32xf32>
    %c9 = arith.constant 9 : index
    %c0_29 = arith.constant 0 : index
    %186 = vector.load %arg2[%c9, %c0_29] : memref<56x32xf32, #tpu.memory_space<vmem>>, vector<1x32xf32>
    %187 = vector.shape_cast %186 : vector<1x32xf32> to vector<1x32xf32>
    %188 = vector.broadcast %187 : vector<1x32xf32> to vector<8x32xf32>
    %189 = vector.extract_strided_slice %182 {offsets = [0, 0], sizes = [8, 128], strides = [1, 1]} : vector<64x128xf32> to vector<8x128xf32>
    %190 = arith.truncf %185 : vector<8x32xf32> to vector<8x32xbf16>
    %cst_30 = arith.constant dense<0.000000e+00> : vector<8x128xf32>
    %191 = tpu.matmul %190, %178, %cst_30 {dimension_numbers = #tpu.dot_dimension_numbers<[1], [0], [0], [1], [0, 0, 1, 1], [], []>} : vector<8x32xbf16>, vector<32x128xbf16>, vector<8x128xf32> -> vector<8x128xf32>
    %192 = arith.addf %189, %191 : vector<8x128xf32>
    %193 = arith.negf %192 : vector<8x128xf32>
    %194 = math.exp %193 : vector<8x128xf32>
    %cst_31 = arith.constant 1.000000e+00 : f32
    %195 = vector.broadcast %cst_31 : f32 to vector<8x128xf32>
    %196 = arith.addf %195, %194 : vector<8x128xf32>
    %197 = arith.divf %195, %196 : vector<8x128xf32>
    %198 = math.tanh %192 : vector<8x128xf32>
    %199 = vector.extract_strided_slice %197 {offsets = [0, 0], sizes = [8, 32], strides = [1, 1]} : vector<8x128xf32> to vector<8x32xf32>
    %200 = vector.extract_strided_slice %197 {offsets = [0, 32], sizes = [8, 32], strides = [1, 1]} : vector<8x128xf32> to vector<8x32xf32>
    %201 = vector.extract_strided_slice %198 {offsets = [0, 64], sizes = [8, 32], strides = [1, 1]} : vector<8x128xf32> to vector<8x32xf32>
    %202 = vector.extract_strided_slice %197 {offsets = [0, 96], sizes = [8, 32], strides = [1, 1]} : vector<8x128xf32> to vector<8x32xf32>
    %203 = arith.mulf %200, %188 : vector<8x32xf32>
    %204 = arith.mulf %199, %201 : vector<8x32xf32>
    %205 = arith.addf %203, %204 : vector<8x32xf32>
    %206 = math.tanh %205 : vector<8x32xf32>
    %207 = arith.mulf %202, %206 : vector<8x32xf32>
    %208 = vector.extract_strided_slice %182 {offsets = [8, 0], sizes = [8, 128], strides = [1, 1]} : vector<64x128xf32> to vector<8x128xf32>
    %209 = arith.truncf %207 : vector<8x32xf32> to vector<8x32xbf16>
    %cst_32 = arith.constant dense<0.000000e+00> : vector<8x128xf32>
    %210 = tpu.matmul %209, %178, %cst_32 {dimension_numbers = #tpu.dot_dimension_numbers<[1], [0], [0], [1], [0, 0, 1, 1], [], []>} : vector<8x32xbf16>, vector<32x128xbf16>, vector<8x128xf32> -> vector<8x128xf32>
    %211 = arith.addf %208, %210 : vector<8x128xf32>
    %212 = arith.negf %211 : vector<8x128xf32>
    %213 = math.exp %212 : vector<8x128xf32>
    %cst_33 = arith.constant 1.000000e+00 : f32
    %214 = vector.broadcast %cst_33 : f32 to vector<8x128xf32>
    %215 = arith.addf %214, %213 : vector<8x128xf32>
    %216 = arith.divf %214, %215 : vector<8x128xf32>
    %217 = math.tanh %211 : vector<8x128xf32>
    %218 = vector.extract_strided_slice %216 {offsets = [0, 0], sizes = [8, 32], strides = [1, 1]} : vector<8x128xf32> to vector<8x32xf32>
    %219 = vector.extract_strided_slice %216 {offsets = [0, 32], sizes = [8, 32], strides = [1, 1]} : vector<8x128xf32> to vector<8x32xf32>
    %220 = vector.extract_strided_slice %217 {offsets = [0, 64], sizes = [8, 32], strides = [1, 1]} : vector<8x128xf32> to vector<8x32xf32>
    %221 = vector.extract_strided_slice %216 {offsets = [0, 96], sizes = [8, 32], strides = [1, 1]} : vector<8x128xf32> to vector<8x32xf32>
    %222 = arith.mulf %219, %205 : vector<8x32xf32>
    %223 = arith.mulf %218, %220 : vector<8x32xf32>
    %224 = arith.addf %222, %223 : vector<8x32xf32>
    %225 = math.tanh %224 : vector<8x32xf32>
    %226 = arith.mulf %221, %225 : vector<8x32xf32>
    %227 = vector.extract_strided_slice %182 {offsets = [16, 0], sizes = [8, 128], strides = [1, 1]} : vector<64x128xf32> to vector<8x128xf32>
    %228 = arith.truncf %226 : vector<8x32xf32> to vector<8x32xbf16>
    %cst_34 = arith.constant dense<0.000000e+00> : vector<8x128xf32>
    %229 = tpu.matmul %228, %178, %cst_34 {dimension_numbers = #tpu.dot_dimension_numbers<[1], [0], [0], [1], [0, 0, 1, 1], [], []>} : vector<8x32xbf16>, vector<32x128xbf16>, vector<8x128xf32> -> vector<8x128xf32>
    %230 = arith.addf %227, %229 : vector<8x128xf32>
    %231 = arith.negf %230 : vector<8x128xf32>
    %232 = math.exp %231 : vector<8x128xf32>
    %cst_35 = arith.constant 1.000000e+00 : f32
    %233 = vector.broadcast %cst_35 : f32 to vector<8x128xf32>
    %234 = arith.addf %233, %232 : vector<8x128xf32>
    %235 = arith.divf %233, %234 : vector<8x128xf32>
    %236 = math.tanh %230 : vector<8x128xf32>
    %237 = vector.extract_strided_slice %235 {offsets = [0, 0], sizes = [8, 32], strides = [1, 1]} : vector<8x128xf32> to vector<8x32xf32>
    %238 = vector.extract_strided_slice %235 {offsets = [0, 32], sizes = [8, 32], strides = [1, 1]} : vector<8x128xf32> to vector<8x32xf32>
    %239 = vector.extract_strided_slice %236 {offsets = [0, 64], sizes = [8, 32], strides = [1, 1]} : vector<8x128xf32> to vector<8x32xf32>
    %240 = vector.extract_strided_slice %235 {offsets = [0, 96], sizes = [8, 32], strides = [1, 1]} : vector<8x128xf32> to vector<8x32xf32>
    %241 = arith.mulf %238, %224 : vector<8x32xf32>
    %242 = arith.mulf %237, %239 : vector<8x32xf32>
    %243 = arith.addf %241, %242 : vector<8x32xf32>
    %244 = math.tanh %243 : vector<8x32xf32>
    %245 = arith.mulf %240, %244 : vector<8x32xf32>
    %246 = vector.extract_strided_slice %182 {offsets = [24, 0], sizes = [8, 128], strides = [1, 1]} : vector<64x128xf32> to vector<8x128xf32>
    %247 = arith.truncf %245 : vector<8x32xf32> to vector<8x32xbf16>
    %cst_36 = arith.constant dense<0.000000e+00> : vector<8x128xf32>
    %248 = tpu.matmul %247, %178, %cst_36 {dimension_numbers = #tpu.dot_dimension_numbers<[1], [0], [0], [1], [0, 0, 1, 1], [], []>} : vector<8x32xbf16>, vector<32x128xbf16>, vector<8x128xf32> -> vector<8x128xf32>
    %249 = arith.addf %246, %248 : vector<8x128xf32>
    %250 = arith.negf %249 : vector<8x128xf32>
    %251 = math.exp %250 : vector<8x128xf32>
    %cst_37 = arith.constant 1.000000e+00 : f32
    %252 = vector.broadcast %cst_37 : f32 to vector<8x128xf32>
    %253 = arith.addf %252, %251 : vector<8x128xf32>
    %254 = arith.divf %252, %253 : vector<8x128xf32>
    %255 = math.tanh %249 : vector<8x128xf32>
    %256 = vector.extract_strided_slice %254 {offsets = [0, 0], sizes = [8, 32], strides = [1, 1]} : vector<8x128xf32> to vector<8x32xf32>
    %257 = vector.extract_strided_slice %254 {offsets = [0, 32], sizes = [8, 32], strides = [1, 1]} : vector<8x128xf32> to vector<8x32xf32>
    %258 = vector.extract_strided_slice %255 {offsets = [0, 64], sizes = [8, 32], strides = [1, 1]} : vector<8x128xf32> to vector<8x32xf32>
    %259 = vector.extract_strided_slice %254 {offsets = [0, 96], sizes = [8, 32], strides = [1, 1]} : vector<8x128xf32> to vector<8x32xf32>
    %260 = arith.mulf %257, %243 : vector<8x32xf32>
    %261 = arith.mulf %256, %258 : vector<8x32xf32>
    %262 = arith.addf %260, %261 : vector<8x32xf32>
    %263 = math.tanh %262 : vector<8x32xf32>
    %264 = arith.mulf %259, %263 : vector<8x32xf32>
    %265 = vector.extract_strided_slice %182 {offsets = [32, 0], sizes = [8, 128], strides = [1, 1]} : vector<64x128xf32> to vector<8x128xf32>
    %266 = arith.truncf %264 : vector<8x32xf32> to vector<8x32xbf16>
    %cst_38 = arith.constant dense<0.000000e+00> : vector<8x128xf32>
    %267 = tpu.matmul %266, %178, %cst_38 {dimension_numbers = #tpu.dot_dimension_numbers<[1], [0], [0], [1], [0, 0, 1, 1], [], []>} : vector<8x32xbf16>, vector<32x128xbf16>, vector<8x128xf32> -> vector<8x128xf32>
    %268 = arith.addf %265, %267 : vector<8x128xf32>
    %269 = arith.negf %268 : vector<8x128xf32>
    %270 = math.exp %269 : vector<8x128xf32>
    %cst_39 = arith.constant 1.000000e+00 : f32
    %271 = vector.broadcast %cst_39 : f32 to vector<8x128xf32>
    %272 = arith.addf %271, %270 : vector<8x128xf32>
    %273 = arith.divf %271, %272 : vector<8x128xf32>
    %274 = math.tanh %268 : vector<8x128xf32>
    %275 = vector.extract_strided_slice %273 {offsets = [0, 0], sizes = [8, 32], strides = [1, 1]} : vector<8x128xf32> to vector<8x32xf32>
    %276 = vector.extract_strided_slice %273 {offsets = [0, 32], sizes = [8, 32], strides = [1, 1]} : vector<8x128xf32> to vector<8x32xf32>
    %277 = vector.extract_strided_slice %274 {offsets = [0, 64], sizes = [8, 32], strides = [1, 1]} : vector<8x128xf32> to vector<8x32xf32>
    %278 = vector.extract_strided_slice %273 {offsets = [0, 96], sizes = [8, 32], strides = [1, 1]} : vector<8x128xf32> to vector<8x32xf32>
    %279 = arith.mulf %276, %262 : vector<8x32xf32>
    %280 = arith.mulf %275, %277 : vector<8x32xf32>
    %281 = arith.addf %279, %280 : vector<8x32xf32>
    %282 = math.tanh %281 : vector<8x32xf32>
    %283 = arith.mulf %278, %282 : vector<8x32xf32>
    %284 = vector.extract_strided_slice %182 {offsets = [40, 0], sizes = [8, 128], strides = [1, 1]} : vector<64x128xf32> to vector<8x128xf32>
    %285 = arith.truncf %283 : vector<8x32xf32> to vector<8x32xbf16>
    %cst_40 = arith.constant dense<0.000000e+00> : vector<8x128xf32>
    %286 = tpu.matmul %285, %178, %cst_40 {dimension_numbers = #tpu.dot_dimension_numbers<[1], [0], [0], [1], [0, 0, 1, 1], [], []>} : vector<8x32xbf16>, vector<32x128xbf16>, vector<8x128xf32> -> vector<8x128xf32>
    %287 = arith.addf %284, %286 : vector<8x128xf32>
    %288 = arith.negf %287 : vector<8x128xf32>
    %289 = math.exp %288 : vector<8x128xf32>
    %cst_41 = arith.constant 1.000000e+00 : f32
    %290 = vector.broadcast %cst_41 : f32 to vector<8x128xf32>
    %291 = arith.addf %290, %289 : vector<8x128xf32>
    %292 = arith.divf %290, %291 : vector<8x128xf32>
    %293 = math.tanh %287 : vector<8x128xf32>
    %294 = vector.extract_strided_slice %292 {offsets = [0, 0], sizes = [8, 32], strides = [1, 1]} : vector<8x128xf32> to vector<8x32xf32>
    %295 = vector.extract_strided_slice %292 {offsets = [0, 32], sizes = [8, 32], strides = [1, 1]} : vector<8x128xf32> to vector<8x32xf32>
    %296 = vector.extract_strided_slice %293 {offsets = [0, 64], sizes = [8, 32], strides = [1, 1]} : vector<8x128xf32> to vector<8x32xf32>
    %297 = vector.extract_strided_slice %292 {offsets = [0, 96], sizes = [8, 32], strides = [1, 1]} : vector<8x128xf32> to vector<8x32xf32>
    %298 = arith.mulf %295, %281 : vector<8x32xf32>
    %299 = arith.mulf %294, %296 : vector<8x32xf32>
    %300 = arith.addf %298, %299 : vector<8x32xf32>
    %301 = math.tanh %300 : vector<8x32xf32>
    %302 = arith.mulf %297, %301 : vector<8x32xf32>
    %303 = vector.extract_strided_slice %182 {offsets = [48, 0], sizes = [8, 128], strides = [1, 1]} : vector<64x128xf32> to vector<8x128xf32>
    %304 = arith.truncf %302 : vector<8x32xf32> to vector<8x32xbf16>
    %cst_42 = arith.constant dense<0.000000e+00> : vector<8x128xf32>
    %305 = tpu.matmul %304, %178, %cst_42 {dimension_numbers = #tpu.dot_dimension_numbers<[1], [0], [0], [1], [0, 0, 1, 1], [], []>} : vector<8x32xbf16>, vector<32x128xbf16>, vector<8x128xf32> -> vector<8x128xf32>
    %306 = arith.addf %303, %305 : vector<8x128xf32>
    %307 = arith.negf %306 : vector<8x128xf32>
    %308 = math.exp %307 : vector<8x128xf32>
    %cst_43 = arith.constant 1.000000e+00 : f32
    %309 = vector.broadcast %cst_43 : f32 to vector<8x128xf32>
    %310 = arith.addf %309, %308 : vector<8x128xf32>
    %311 = arith.divf %309, %310 : vector<8x128xf32>
    %312 = math.tanh %306 : vector<8x128xf32>
    %313 = vector.extract_strided_slice %311 {offsets = [0, 0], sizes = [8, 32], strides = [1, 1]} : vector<8x128xf32> to vector<8x32xf32>
    %314 = vector.extract_strided_slice %311 {offsets = [0, 32], sizes = [8, 32], strides = [1, 1]} : vector<8x128xf32> to vector<8x32xf32>
    %315 = vector.extract_strided_slice %312 {offsets = [0, 64], sizes = [8, 32], strides = [1, 1]} : vector<8x128xf32> to vector<8x32xf32>
    %316 = vector.extract_strided_slice %311 {offsets = [0, 96], sizes = [8, 32], strides = [1, 1]} : vector<8x128xf32> to vector<8x32xf32>
    %317 = arith.mulf %314, %300 : vector<8x32xf32>
    %318 = arith.mulf %313, %315 : vector<8x32xf32>
    %319 = arith.addf %317, %318 : vector<8x32xf32>
    %320 = math.tanh %319 : vector<8x32xf32>
    %321 = arith.mulf %316, %320 : vector<8x32xf32>
    %c16 = arith.constant 16 : index
    %c0_44 = arith.constant 0 : index
    %322 = vector.load %arg2[%c16, %c0_44] : memref<56x32xf32, #tpu.memory_space<vmem>>, vector<32x16xf32>
    %323 = arith.truncf %322 : vector<32x16xf32> to vector<32x16xbf16>
    %c48 = arith.constant 48 : index
    %c0_45 = arith.constant 0 : index
    %324 = vector.load %arg2[%c48, %c0_45] : memref<56x32xf32, #tpu.memory_space<vmem>>, vector<1x16xf32>
    %325 = tpu.concatenate %207, %226, %245, %264, %283, %302, %321 in 0 : vector<8x32xf32>, vector<8x32xf32>, vector<8x32xf32>, vector<8x32xf32>, vector<8x32xf32>, vector<8x32xf32>, vector<8x32xf32> -> vector<56x32xf32>
    %326 = arith.truncf %325 : vector<56x32xf32> to vector<56x32xbf16>
    %cst_46 = arith.constant dense<0.000000e+00> : vector<56x16xf32>
    %327 = tpu.matmul %326, %323, %cst_46 {dimension_numbers = #tpu.dot_dimension_numbers<[1], [0], [0], [1], [0, 0, 1, 1], [], []>} : vector<56x32xbf16>, vector<32x16xbf16>, vector<56x16xf32> -> vector<56x16xf32>
    %328 = vector.broadcast %324 : vector<1x16xf32> to vector<56x16xf32>
    %329 = arith.addf %327, %328 : vector<56x16xf32>
    %cst_47 = arith.constant dense<0xFF800000> : vector<56xf32>
    %330 = vector.multi_reduction <maximumf>, %329, %cst_47 [1] : vector<56x16xf32> to vector<56xf32>
    %331 = vector.shape_cast %330 : vector<56xf32> to vector<56x1xf32>
    %332 = vector.broadcast %331 : vector<56x1xf32> to vector<56x16xf32>
    %333 = arith.subf %329, %332 : vector<56x16xf32>
    %334 = math.exp %333 : vector<56x16xf32>
    %cst_48 = arith.constant dense<0.000000e+00> : vector<56xf32>
    %335 = vector.multi_reduction <add>, %334, %cst_48 [1] : vector<56x16xf32> to vector<56xf32>
    %336 = vector.shape_cast %335 : vector<56xf32> to vector<56x1xf32>
    %337 = math.log %336 : vector<56x1xf32>
    %338 = vector.broadcast %337 : vector<56x1xf32> to vector<56x16xf32>
    %339 = arith.subf %333, %338 : vector<56x16xf32>
    %c0_49 = arith.constant 0 : index
    %c1_50 = arith.constant 1 : index
    %340 = vector.load %arg0[%c0_49, %c1_50] : memref<64x2xi32, #tpu.memory_space<vmem>>, vector<56x1xi32>
    %c0_i32 = arith.constant 0 : i32
    %341 = vector.broadcast %c0_i32 : i32 to vector<56x1xi32>
    %342 = arith.cmpi sgt, %340, %341 : vector<56x1xi32>
    %cst_51 = arith.constant 0.000000e+00 : f32
    %343 = vector.shape_cast %342 : vector<56x1xi1> to vector<56x1xi1>
    %344 = vector.broadcast %343 : vector<56x1xi1> to vector<56x16xi1>
    %345 = vector.broadcast %cst_51 : f32 to vector<56x16xf32>
    %346 = arith.select %344, %339, %345 : vector<56x16xi1>, vector<56x16xf32>
    %c0_52 = arith.constant 0 : index
    %c0_53 = arith.constant 0 : index
    %347 = vector.load %arg3[%c0_52, %c0_53] : memref<56x16xf32, #tpu.memory_space<vmem>>, vector<56x16xf32>
    tpu.vector_store %arg3[%c0_52, %c0_53], %346 {strides = array<i32>} : memref<56x16xf32, #tpu.memory_space<vmem>>, vector<56x16xf32>,
    return
  }
}

</mosaic_0001>

<bundles_post_ra>
// kernel: tpu_custom_call.1
= control target key start
LH: loop header
LB: loop body
LE: loop exit
PB: predicated region body
PF: predicated region fallthrough
CT: control target
= control target key end

     0   :  { %v2066_v0 = vmov 0   ;;  %v2067_v6 = vmov 0.0   ;;  %vm2068_vm0 = vmmov 0   ;;  %s2069_s15 = smov 32   ;;  %v23_v20 = vlaneseq  ;;  %s2070_s20 = smov 64   ;;  %s2593_s0 = inlined_call_operand.vmem [shape: s32[64,2], index: 0, kind: input, shape index: {}]   ;;  %s2594_s1 = inlined_call_operand.vmem [shape: f32[144,128], index: 1, kind: input, shape index: {}]   ;;  %s2595_s2 = inlined_call_operand.vmem [shape: f32[56,32], index: 2, kind: input, shape index: {}]   ;;  %s2596_s3 = inlined_call_operand.vmem [shape: f32[56,16], index: 3, kind: output, shape index: {}]  }
   0x1   :  { %1915 = vset.pattern.permute.xlu1 %v2066_v0  ;;  %1914 = vset.pattern.permute.xlu0 %v2066_v0  ;;  %v17_v1 = vld [vmem:[%s2593_s0 + $0x10] sm:$0xff]  ;;  %v15_v2 = vld [vmem:[%s2593_s0] sm:$0xff]  ;;  %v18_v3 = vld [vmem:[%s2593_s0 + $0x18] sm:$0xff]  ;;  %vm91_vm5 = vcmask 130048   ;;  %vm180_vm10 = vcmask 261120  }
   0x2   :  { %32 = vperm.xlu1 %1915, %v17_v1   ;;  %26 = vperm.xlu0 %1914, %v15_v2   ;;  %v16_v4 = vld [vmem:[%s2593_s0 + $0x8] sm:$0xff]  ;;  %v77_v5 = vld [vmem:[%s2594_s1] sm:$0xff]  ;;  %v82_v11 = vld [vmem:[%s2594_s1 + $0x30] sm:$0xff]  ;;  %v24_v21 = vand.u32 127, %v23_v20 }
   0x3   :  { %1772 = vmatprep.subr.bf16.mxu1 %v2067_v6  ;;  %v78_v7 = vld [vmem:[%s2594_s1 + $0x8] sm:$0xff]  ;;  %v19_v10 = vld [vmem:[%s2593_s0 + $0x20] sm:$0xff]  ;;  %v83_v12 = vld [vmem:[%s2594_s1 + $0x38] sm:$0xff]  ;;  %1776 = vmatprep.mubr.msk.bf16.mxu1 %vm2068_vm0, %v2067_v6 }
   0x4   :  { %v79_v8 = vpack.c.bf16 %v78_v7, %v77_v5  ;;  %v20_v9 = vld [vmem:[%s2593_s0 + $0x28] sm:$0xff]  ;;  %v2126_v13 = vpack.c.bf16 %v83_v12, %v82_v11  ;;  %v22_v14 = vld [vmem:[%s2593_s0 + $0x38] sm:$0xff]  ;;  %v21_v15 = vld [vmem:[%s2593_s0 + $0x30] sm:$0xff] }
   0x5   :  { %v80_v16 = vld [vmem:[%s2594_s1 + $0x20] sm:$0xff]  ;;  %v81_v17 = vld [vmem:[%s2594_s1 + $0x28] sm:$0xff] }
   0x6   :  { %35 = vperm.xlu1 %1915, %v18_v3   ;;  %29 = vperm.xlu0 %1914, %v16_v4   ;;  %v2142_v18 = vpack.c.bf16 %v81_v17, %v80_v16  ;;  %v1649_v19 = vld [vmem:[%s2595_s2 + $0x8] ss:$0 sm:$0xff]  ;;  %v1648_v42 = vld [vmem:[%s2595_s2] ss:$0 sm:$0xff] }
   0x7   :  { %1754 = vmatprep.subr.bf16.mxu0 %v79_v8  ;;  %1773 = vmatpush3.bf16.msra.mxu1 %v2126_v13  ;;  %v179_v43 = vpack.c.bf16 %v1648_v42, %v1648_v42  ;;  %v1643_v44 = vld [vmem:[%s2594_s1 + $0x40] ss:$0 sm:$0xff] }
   0x8   :  { %1755 = vmatpush3.bf16.msra.mxu0 %v79_v8  ;;  %1774 = vmatprep.subr.bf16.mxu1 %v2067_v6 }
   0x9   :  { %1764 = vmatprep.subr.bf16.mxu0 %v2067_v6 }
   0xa   :  { %41 = vperm.xlu1 %1915, %v20_v9   ;;  %38 = vperm.xlu0 %1914, %v19_v10  }
   0xb   :  { %1775 = vmatpush3.bf16.msra.mxu1 %v2142_v18 }
   0xc   :  { %1788 = vmatprep.subr.bf16.mxu1 %v2067_v6 }
   0xe   :  { %47 = vperm.xlu1 %1915, %v22_v14   ;;  %44 = vperm.xlu0 %1914, %v21_v15  }
  0x12   :  { %233 = vrot.lane.b32.xlu1 %v1649_v19, %s2069_s15 }
  0x7d   :  { %v33_v22 = vpop.permute.xlu1 %32  ;;  %v27_v23 = vpop.permute.xlu0 %26 }
  0x7e   :  { %vm51_vm1 = vcmp.eq.s32.totalorder %v24_v21, %v33_v22  ;;  %vm49_vm2 = vcmp.eq.s32.totalorder %v24_v21, %v27_v23 }
  0x7f   :  { %v1637_v26 = vsel %vm51_vm1, 1.0, %v2067_v6  ;;  %v1635_v27 = vsel %vm49_vm2, 1.0, %v2067_v6 }
  0x81   :  { %v36_v24 = vpop.permute.xlu1 %35  ;;  %v30_v25 = vpop.permute.xlu0 %29 }
  0x82   :  { %vm52_vm3 = vcmp.eq.s32.totalorder %v24_v21, %v36_v24  ;;  %vm50_vm4 = vcmp.eq.s32.totalorder %v24_v21, %v30_v25 }
  0x83   :  { %v1638_v28 = vsel %vm52_vm3, 1.0, %v2067_v6  ;;  %v1636_v29 = vsel %vm50_vm4, 1.0, %v2067_v6 }
  0x84   :  { %v74_v30 = vpack.c.bf16 %v1638_v28, %v1637_v26  ;;  %v73_v31 = vpack.c.bf16 %v1636_v29, %v1635_v27 }
  0x85   :  { %v42_v32 = vpop.permute.xlu1 %41  ;;  %v39_v33 = vpop.permute.xlu0 %38 }
  0x86   :  { %vm54_vm6 = vcmp.eq.s32.totalorder %v24_v21, %v42_v32  ;;  %vm53_vm7 = vcmp.eq.s32.totalorder %v24_v21, %v39_v33  ;;  %1756 = vmatprep.mubr.msk.bf16.mxu0 %vm91_vm5, %v73_v31 }
  0x87   :  { %v1640_v34 = vsel %vm54_vm6, 1.0, %v2067_v6  ;;  %v1639_v35 = vsel %vm53_vm7, 1.0, %v2067_v6  ;;  %1757 = vmatmul.mubr.msk.bf16.vlgmr.msra.gmra.mxu0 %vm91_vm5, %v74_v30 }
  0x88   :  { %v75_v36 = vpack.c.bf16 %v1640_v34, %v1639_v35  ;;  %1765 = vmatpush3.bf16.msra.mxu0 %v2126_v13 }
  0x89   :  { %v48_v37 = vpop.permute.xlu1 %47  ;;  %v45_v38 = vpop.permute.xlu0 %44  ;;  %1766 = vmatprep.subr.bf16.mxu0 %v2067_v6 }
  0x8a   :  { %vm56_vm8 = vcmp.eq.s32.totalorder %v24_v21, %v48_v37  ;;  %vm55_vm9 = vcmp.eq.s32.totalorder %v24_v21, %v45_v38  ;;  %1760 = vmatprep.mubr.msk.bf16.mxu0 %vm91_vm5, %v75_v36 }
  0x8b   :  { %v1642_v39 = vsel %vm56_vm8, 1.0, %v2067_v6  ;;  %v1641_v40 = vsel %vm55_vm9, 1.0, %v2067_v6 }
  0x8c   :  { %v76_v41 = vpack.c.bf16 %v1642_v39, %v1641_v40  ;;  %1767 = vmatpush3.bf16.msra.mxu0 %v2142_v18 }
  0x8d   :  { %1780 = vmatprep.subr.bf16.mxu0 %v2067_v6  ;;  %v234_v11 = vpop.permute.xlu1 %233 }
  0x8f   :  { %1761 = vmatmul.mubr.msk.bf16.gmra.mxu0 %vm91_vm5, %v76_v41 }
  0x90   :  { %1768 = vmatprep.mubr.msk.bf16.mxu0 %vm2068_vm0, %v2067_v6 }
  0x97   :  { %1769 = vmatmul.mubr.msk.bf16.vlgmr.msra.gmra.mxu0 %vm180_vm10, %v179_v43 }
  0x98   :  { %1781 = vmatpush3.bf16.msra.mxu0 %v2126_v13  ;;  %1784 = vmatprep.mubr.msk.bf16.mxu0 %vm2068_vm0, %v2067_v6 }
  0x99   :  { %1782 = vmatprep.subr.bf16.mxu0 %v2067_v6 }
  0x9c   :  { %1783 = vmatpush3.bf16.msra.mxu0 %v2142_v18 }
  0x9d   :  { %1796 = vmatprep.subr.bf16.mxu0 %v2067_v6 }
 0x147   :  { %v1758_v45 = vpop.f32.mrf.mxu0 }
 0x148   :  { %v2183_v46 = vadd.f32 %v1758_v45, %v1643_v44 }
 0x149   :  { %v138_v47 = vpop.f32.mrf.mxu0 }
 0x14a   :  { %v139_v59 = vadd.f32 %v1643_v44, %v138_v47 }
 0x14b   :  { %v1759_v48 = vpop.f32.mrf.mxu0 }
 0x14c   :  { %v2185_v49 = vadd.f32 %v1759_v48, %v1643_v44 }
 0x14d   :  { %v141_v50 = vpop.f32.mrf.mxu0 }
 0x14e   :  { %v142_v51 = vadd.f32 %v1643_v44, %v141_v50 }
 0x14f   :  { %v1762_v52 = vpop.f32.mrf.mxu0 }
 0x150   :  { %v2187_v53 = vadd.f32 %v1762_v52, %v1643_v44 }
 0x151   :  { %v154_v54 = vpop.f32.mrf.mxu0 }
 0x152   :  { %v2189_v55 = vadd.f32 %v1643_v44, %v154_v54 }
 0x153   :  { %v1763_v56 = vpop.f32.mrf.mxu0 }
 0x154   :  { %v2191_v57 = vadd.f32 %v1763_v56, %v1643_v44 }
 0x155   :  { %v157_v58 = vpop.f32.mrf.mxu0 }
 0x156   :  { %v2193_v60 = vadd.f32 %v1643_v44, %v157_v58 }
 0x157   :  { %v218_v61 = vpop.f32.mrf.mxu0 }
 0x158   :  { %v224_v62 = vadd.f32 %v218_v61, %v139_v59 }
 0x159   :  { %v1770_v63 = vpop.f32.mrf.mxu0 }
 0x15a   :  { %1918 = vtanh.f32 %v224_v62  ;;  %v1651_v4 = vmul.f32 -1.442695, %v224_v62 }
 0x15b   :  { %v221_v1 = vpop.f32.mrf.mxu0 }
 0x15c   :  { %1920 = vpow2.f32 %v1651_v4 }
 0x15d   :  { %v1771_v2 = vpop.f32.mrf.mxu0 }
 0x167   :  { %v1919_v3 = vpop.eup %1918 }
 0x168   :  { %238 = vrot.lane.b32.xlu0 %v1919_v3, %s2070_s20 }
 0x169   :  { %v1921_v5 = vpop.eup %1920 }
 0x16a   :  { %v228_v7 = vadd.f32 1.0, %v1921_v5 }
 0x16c   :  { %1922 = vrcp.f32 %v228_v7 }
 0x179   :  { %v1923_v8 = vpop.eup %1922 }
 0x17a   :  { %v236_v12 = vmul.f32 %v1923_v8, %v234_v11 }
 0x1da   :  { %v239_v9 = vpop.permute.xlu0 %238 }
 0x1db   :  { %v241_v10 = vmul.f32 %v1923_v8, %v239_v9 }
 0x1dd   :  { %243 = vrot.lane.b32.xlu0 %v241_v10, %s2069_s15 }
 0x24f   :  { %v244_v14 = vpop.permute.xlu0 %243 }
 0x250   :  { %v246_v15 = vadd.f32 %v244_v14, %v236_v12 }
 0x252   :  { %1924 = vtanh.f32 %v246_v15 }
 0x25f   :  { %v1925_v16 = vpop.eup %1924 }
 0x260   :  { %249 = vrot.lane.b32.xlu1 %v1925_v16, %s2070_s20 }
 0x2d2   :  { %v250_v17 = vpop.permute.xlu1 %249 }
 0x2d3   :  { %v2198_v19 = vmul.f32 %v1923_v8, %v250_v17 }
 0x2d5   :  { %v253_v20 = vpack.c.bf16 %v2198_v19, %v2198_v19 }
 0x2d7   :  { %255 = vrot.lane.b32.xlu0 %v253_v20, %s2069_s15 }
 0x349   :  { %v256_v21 = vpop.permute.xlu0 %255 }
 0x34a   :  { %1777 = vmatmul.mubr.msk.bf16.vlgmr.msra.gmra.mxu1 %vm180_vm10, %v256_v21 }
 0x34b   :  { %1789 = vmatpush3.bf16.msra.mxu1 %v2126_v13  ;;  %1792 = vmatprep.mubr.msk.bf16.mxu1 %vm2068_vm0, %v2067_v6 }
 0x34c   :  { %1790 = vmatprep.subr.bf16.mxu1 %v2067_v6 }
 0x34f   :  { %1791 = vmatpush3.bf16.msra.mxu1 %v2142_v18 }
 0x350   :  { %1804 = vmatprep.subr.bf16.mxu1 %v2067_v6 }
 0x40a   :  { %v294_v22 = vpop.f32.mrf.mxu1 }
 0x40b   :  { %v300_v23 = vadd.f32 %v294_v22, %v142_v51 }
 0x40c   :  { %v1778_v24 = vpop.f32.mrf.mxu1 }
 0x40d   :  { %1926 = vtanh.f32 %v300_v23  ;;  %v1653_v28 = vmul.f32 -1.442695, %v300_v23 }
 0x40e   :  { %v297_v25 = vpop.f32.mrf.mxu1 }
 0x40f   :  { %1928 = vpow2.f32 %v1653_v28 }
 0x410   :  { %v1779_v26 = vpop.f32.mrf.mxu1 }
 0x41a   :  { %v1927_v27 = vpop.eup %1926 }
 0x41b   :  { %310 = vrot.lane.b32.xlu1 %v1927_v27, %s2070_s20 }
 0x41c   :  { %v1929_v29 = vpop.eup %1928 }
 0x41d   :  { %v304_v30 = vadd.f32 1.0, %v1929_v29 }
 0x41f   :  { %1930 = vrcp.f32 %v304_v30 }
 0x42c   :  { %v1931_v31 = vpop.eup %1930 }
 0x42d   :  { %v308_v34 = vmul.f32 %v1931_v31, %v246_v15 }
 0x48d   :  { %v311_v32 = vpop.permute.xlu1 %310 }
 0x48e   :  { %v313_v33 = vmul.f32 %v1931_v31, %v311_v32 }
 0x490   :  { %315 = vrot.lane.b32.xlu0 %v313_v33, %s2069_s15 }
 0x502   :  { %v316_v35 = vpop.permute.xlu0 %315 }
 0x503   :  { %v318_v36 = vadd.f32 %v316_v35, %v308_v34 }
 0x505   :  { %1932 = vtanh.f32 %v318_v36 }
 0x512   :  { %v1933_v37 = vpop.eup %1932 }
 0x513   :  { %321 = vrot.lane.b32.xlu1 %v1933_v37, %s2070_s20 }
 0x585   :  { %v322_v38 = vpop.permute.xlu1 %321 }
 0x586   :  { %v2213_v39 = vmul.f32 %v1931_v31, %v322_v38 }
 0x588   :  { %v325_v40 = vpack.c.bf16 %v2213_v39, %v2213_v39 }
 0x58a   :  { %327 = vrot.lane.b32.xlu0 %v325_v40, %s2069_s15 }
 0x5fc   :  { %v328_v41 = vpop.permute.xlu0 %327 }
 0x5fd   :  { %1785 = vmatmul.mubr.msk.bf16.vlgmr.msra.gmra.mxu0 %vm180_vm10, %v328_v41 }
 0x5fe   :  { %1797 = vmatpush3.bf16.msra.mxu0 %v2126_v13  ;;  %1800 = vmatprep.mubr.msk.bf16.mxu0 %vm2068_vm0, %v2067_v6 }
 0x5ff   :  { %1798 = vmatprep.subr.bf16.mxu0 %v2067_v6 }
 0x602   :  { %1799 = vmatpush3.bf16.msra.mxu0 %v2142_v18 }
 0x603   :  { %1812 = vmatprep.subr.bf16.mxu0 %v2067_v6 }
 0x6bd   :  { %v366_v42 = vpop.f32.mrf.mxu0 }
 0x6be   :  { %v372_v43 = vadd.f32 %v366_v42, %v2183_v46 }
 0x6bf   :  { %v1786_v44 = vpop.f32.mrf.mxu0 }
 0x6c0   :  { %1934 = vtanh.f32 %v372_v43  ;;  %v1655_v50 = vmul.f32 -1.442695, %v372_v43 }
 0x6c1   :  { %v369_v45 = vpop.f32.mrf.mxu0 }
 0x6c2   :  { %1936 = vpow2.f32 %v1655_v50 }
 0x6c3   :  { %v1787_v47 = vpop.f32.mrf.mxu0 }
 0x6cd   :  { %v1935_v48 = vpop.eup %1934 }
 0x6ce   :  { %382 = vrot.lane.b32.xlu1 %v1935_v48, %s2070_s20 }
 0x6cf   :  { %v1937_v51 = vpop.eup %1936 }
 0x6d0   :  { %v376_v52 = vadd.f32 1.0, %v1937_v51 }
 0x6d2   :  { %1938 = vrcp.f32 %v376_v52 }
 0x6df   :  { %v1939_v54 = vpop.eup %1938 }
 0x6e0   :  { %v380_v59 = vmul.f32 %v1939_v54, %v318_v36 }
 0x740   :  { %v383_v56 = vpop.permute.xlu1 %382 }
 0x741   :  { %v385_v58 = vmul.f32 %v1939_v54, %v383_v56 }
 0x743   :  { %387 = vrot.lane.b32.xlu0 %v385_v58, %s2069_s15 }
 0x7b5   :  { %v388_v61 = vpop.permute.xlu0 %387 }
 0x7b6   :  { %v390_v46 = vadd.f32 %v388_v61, %v380_v59 }
 0x7b8   :  { %1940 = vtanh.f32 %v390_v46 }
 0x7c5   :  { %v1941_v62 = vpop.eup %1940 }
 0x7c6   :  { %393 = vrot.lane.b32.xlu1 %v1941_v62, %s2070_s20 }
 0x838   :  { %v394_v63 = vpop.permute.xlu1 %393 }
 0x839   :  { %v2229_v1 = vmul.f32 %v1939_v54, %v394_v63 }
 0x83b   :  { %v397_v2 = vpack.c.bf16 %v2229_v1, %v2229_v1 }
 0x83d   :  { %399 = vrot.lane.b32.xlu0 %v397_v2, %s2069_s15 }
 0x8af   :  { %v400_v3 = vpop.permute.xlu0 %399 }
 0x8b0   :  { %1793 = vmatmul.mubr.msk.bf16.vlgmr.msra.gmra.mxu1 %vm180_vm10, %v400_v3 }
 0x8b1   :  { %1805 = vmatpush3.bf16.msra.mxu1 %v2126_v13  ;;  %1808 = vmatprep.mubr.msk.bf16.mxu1 %vm2068_vm0, %v2067_v6 }
 0x8b2   :  { %1806 = vmatprep.subr.bf16.mxu1 %v2067_v6 }
 0x8b5   :  { %1807 = vmatpush3.bf16.msra.mxu1 %v2142_v18 }
 0x8b6   :  { %1820 = vmatprep.subr.bf16.mxu1 %v2067_v6 }
 0x970   :  { %v438_v4 = vpop.f32.mrf.mxu1 }
 0x971   :  { %v444_v5 = vadd.f32 %v438_v4, %v2185_v49 }
 0x972   :  { %v1794_v7 = vpop.f32.mrf.mxu1 }
 0x973   :  { %1942 = vtanh.f32 %v444_v5  ;;  %v1657_v11 = vmul.f32 -1.442695, %v444_v5 }
 0x974   :  { %v441_v8 = vpop.f32.mrf.mxu1 }
 0x975   :  { %1944 = vpow2.f32 %v1657_v11 }
 0x976   :  { %v1795_v9 = vpop.f32.mrf.mxu1 }
 0x980   :  { %v1943_v10 = vpop.eup %1942 }
 0x981   :  { %454 = vrot.lane.b32.xlu1 %v1943_v10, %s2070_s20 }
 0x982   :  { %v1945_v12 = vpop.eup %1944 }
 0x983   :  { %v448_v14 = vadd.f32 1.0, %v1945_v12 }
 0x985   :  { %1946 = vrcp.f32 %v448_v14 }
 0x992   :  { %v1947_v15 = vpop.eup %1946 }
 0x993   :  { %v452_v20 = vmul.f32 %v1947_v15, %v390_v46 }
 0x9f3   :  { %v455_v16 = vpop.permute.xlu1 %454 }
 0x9f4   :  { %v457_v17 = vmul.f32 %v1947_v15, %v455_v16 }
 0x9f6   :  { %459 = vrot.lane.b32.xlu0 %v457_v17, %s2069_s15 }
 0xa68   :  { %v460_v21 = vpop.permute.xlu0 %459 }
 0xa69   :  { %v462_v49 = vadd.f32 %v460_v21, %v452_v20 }
 0xa6b   :  { %1948 = vtanh.f32 %v462_v49 }
 0xa78   :  { %v1949_v22 = vpop.eup %1948 }
 0xa79   :  { %465 = vrot.lane.b32.xlu1 %v1949_v22, %s2070_s20 }
 0xaeb   :  { %v466_v23 = vpop.permute.xlu1 %465 }
 0xaec   :  { %v2245_v24 = vmul.f32 %v1947_v15, %v466_v23 }
 0xaee   :  { %v469_v25 = vpack.c.bf16 %v2245_v24, %v2245_v24 }
 0xaf0   :  { %471 = vrot.lane.b32.xlu0 %v469_v25, %s2069_s15  ;;  %v763_v25 = vld [vmem:[%s2594_s1 + $0x58] sm:$0xff] }
 0xb62   :  { %v472_v26 = vpop.permute.xlu0 %471 }
 0xb63   :  { %1801 = vmatmul.mubr.msk.bf16.vlgmr.msra.gmra.mxu0 %vm180_vm10, %v472_v26  ;;  %v764_v26 = vld [vmem:[%s2594_s1 + $0x60] sm:$0xff] }
 0xb64   :  { %1813 = vmatpush3.bf16.msra.mxu0 %v2126_v13  ;;  %1816 = vmatprep.mubr.msk.bf16.mxu0 %vm2068_vm0, %v2067_v6 }
 0xb65   :  { %1814 = vmatprep.subr.bf16.mxu0 %v2067_v6 }
 0xb68   :  { %1815 = vmatpush3.bf16.msra.mxu0 %v2142_v18 }
 0xc23   :  { %v510_v27 = vpop.f32.mrf.mxu0 }
 0xc24   :  { %v516_v28 = vadd.f32 %v510_v27, %v2189_v55  ;;  %v761_v27 = vld [vmem:[%s2594_s1 + $0x48] sm:$0xff] }
 0xc25   :  { %v1802_v29 = vpop.f32.mrf.mxu0 }
 0xc26   :  { %1950 = vtanh.f32 %v516_v28  ;;  %v1659_v33 = vmul.f32 -1.442695, %v516_v28  ;;  %v766_v28 = vpack.c.bf16 %v764_v26, %v763_v25  ;;  %v762_v29 = vld [vmem:[%s2594_s1 + $0x50] sm:$0xff] }
 0xc27   :  { %v513_v30 = vpop.f32.mrf.mxu0 }
 0xc28   :  { %1952 = vpow2.f32 %v1659_v33  ;;  %v765_v30 = vpack.c.bf16 %v762_v29, %v761_v27  ;;  %1828 = vmatprep.subr.bf16.mxu0 %v766_v28 }
 0xc29   :  { %v1803_v31 = vpop.f32.mrf.mxu0 }
 0xc33   :  { %v1951_v32 = vpop.eup %1950 }
 0xc34   :  { %526 = vrot.lane.b32.xlu1 %v1951_v32, %s2070_s20  ;;  %v757_v32 = vpack.c.bf16 %v2213_v39, %v2198_v19  ;;  %v1672_v19 = vld [vmem:[%s2595_s2 + $0x9] ss:$0 sm:$0xff]  ;;  %v769_v39 = vld [vmem:[%s2594_s1 + $0x78] sm:$0xff] }
 0xc35   :  { %v1953_v34 = vpop.eup %1952 }
 0xc36   :  { %v520_v35 = vadd.f32 1.0, %v1953_v34 }
 0xc38   :  { %1954 = vrcp.f32 %v520_v35 }
 0xc45   :  { %v1955_v36 = vpop.eup %1954 }
 0xc46   :  { %v524_v40 = vmul.f32 %v1955_v36, %v462_v49 }
 0xca6   :  { %v527_v37 = vpop.permute.xlu1 %526 }
 0xca7   :  { %v529_v38 = vmul.f32 %v1955_v36, %v527_v37  ;;  %v758_v37 = vpack.c.bf16 %v2245_v24, %v2229_v1  ;;  %v767_v1 = vld [vmem:[%s2594_s1 + $0x68] sm:$0xff]  ;;  %v768_v24 = vld [vmem:[%s2594_s1 + $0x70] sm:$0xff] }
 0xca9   :  { %531 = vrot.lane.b32.xlu0 %v529_v38, %s2069_s15  ;;  %v770_v38 = vld [vmem:[%s2594_s1 + $0x80] sm:$0xff] }
 0xd1b   :  { %v532_v41 = vpop.permute.xlu0 %531 }
 0xd1c   :  { %v534_v55 = vadd.f32 %v532_v41, %v524_v40  ;;  %v2324_v40 = vpack.c.bf16 %v770_v38, %v769_v39 }
 0xd1e   :  { %1956 = vtanh.f32 %v534_v55 }
 0xd2b   :  { %v1957_v42 = vpop.eup %1956 }
 0xd2c   :  { %537 = vrot.lane.b32.xlu1 %v1957_v42, %s2070_s20  ;;  %v1671_v42 = vld [vmem:[%s2595_s2 + $0x1] ss:$0 sm:$0xff] }
 0xd9e   :  { %v538_v43 = vpop.permute.xlu1 %537 }
 0xd9f   :  { %v2260_v44 = vmul.f32 %v1955_v36, %v538_v43 }
 0xda1   :  { %v541_v45 = vpack.c.bf16 %v2260_v44, %v2260_v44 }
 0xda3   :  { %543 = vrot.lane.b32.xlu0 %v541_v45, %s2069_s15  ;;  %v876_v45 = vpack.c.bf16 %v1671_v42, %v1671_v42 }
 0xe15   :  { %v544_v47 = vpop.permute.xlu0 %543 }
 0xe16   :  { %1809 = vmatmul.mubr.msk.bf16.vlgmr.msra.gmra.mxu1 %vm180_vm10, %v544_v47 }
 0xe17   :  { %1821 = vmatpush3.bf16.msra.mxu1 %v2126_v13  ;;  %1824 = vmatprep.mubr.msk.bf16.mxu1 %vm2068_vm0, %v2067_v6 }
 0xe18   :  { %1822 = vmatprep.subr.bf16.mxu1 %v2067_v6 }
 0xe1b   :  { %1823 = vmatpush3.bf16.msra.mxu1 %v2142_v18 }
 0xe1c   :  { %1840 = vmatprep.subr.bf16.mxu1 %v2067_v6 }
 0xed6   :  { %v582_v48 = vpop.f32.mrf.mxu1 }
 0xed7   :  { %v588_v50 = vadd.f32 %v582_v48, %v2193_v60 }
 0xed8   :  { %v1810_v51 = vpop.f32.mrf.mxu1 }
 0xed9   :  { %1958 = vtanh.f32 %v588_v50  ;;  %v1661_v13 = vmul.f32 -1.442695, %v588_v50 }
 0xeda   :  { %v585_v52 = vpop.f32.mrf.mxu1 }
 0xedb   :  { %1960 = vpow2.f32 %v1661_v13 }
 0xedc   :  { %v1811_v54 = vpop.f32.mrf.mxu1 }
 0xedd   :  { %v2362_v54 = vld [vmem:[%s2594_s1 + $0x88] ss:$0 sm:$0xff] }
 0xee6   :  { %v1959_v56 = vpop.eup %1958 }
 0xee7   :  { %598 = vrot.lane.b32.xlu1 %v1959_v56, %s2070_s20 }
 0xee8   :  { %v1961_v58 = vpop.eup %1960 }
 0xee9   :  { %v592_v59 = vadd.f32 1.0, %v1961_v58 }
 0xeeb   :  { %1962 = vrcp.f32 %v592_v59 }
 0xef8   :  { %v1963_v61 = vpop.eup %1962 }
 0xef9   :  { %v596_v62 = vmul.f32 %v1963_v61, %v534_v55  ;;  %v2334_v55 = vpack.c.bf16 %v768_v24, %v767_v1 }
 0xf59   :  { %v599_v46 = vpop.permute.xlu1 %598 }
 0xf5a   :  { %v601_v18 = vmul.f32 %v1963_v61, %v599_v46 }
 0xf5c   :  { %603 = vrot.lane.b32.xlu0 %v601_v18, %s2069_s15 }
 0xfce   :  { %v604_v63 = vpop.permute.xlu0 %603 }
 0xfcf   :  { %v606_v60 = vadd.f32 %v604_v63, %v596_v62 }
 0xfd1   :  { %1964 = vtanh.f32 %v606_v60 }
 0xfde   :  { %v1965_v2 = vpop.eup %1964 }
 0xfdf   :  { %609 = vrot.lane.b32.xlu1 %v1965_v2, %s2070_s20 }
0x1051   :  { %v610_v3 = vpop.permute.xlu1 %609 }
0x1052   :  { %v2276_v4 = vmul.f32 %v1963_v61, %v610_v3 }
0x1054   :  { %v613_v5 = vpack.c.bf16 %v2276_v4, %v2276_v4 }
0x1056   :  { %615 = vrot.lane.b32.xlu0 %v613_v5, %s2069_s15 }
0x10c8   :  { %v616_v7 = vpop.permute.xlu0 %615 }
0x10c9   :  { %1817 = vmatmul.mubr.msk.bf16.vlgmr.msra.gmra.mxu0 %vm180_vm10, %v616_v7 }
0x10ca   :  { %1829 = vmatpush3.bf16.msra.mxu0 %v766_v28 }
0x10cb   :  { %1830 = vmatprep.subr.bf16.mxu0 %v765_v30 }
0x10ce   :  { %1831 = vmatpush3.bf16.msra.mxu0 %v765_v30 }
0x10cf   :  { %1856 = vmatprep.subr.bf16.mxu0 %v2067_v6 }
0x1189   :  { %v654_v8 = vpop.f32.mrf.mxu0 }
0x118a   :  { %v660_v9 = vadd.f32 %v654_v8, %v2187_v53 }
0x118b   :  { %v1818_v10 = vpop.f32.mrf.mxu0 }
0x118c   :  { %1966 = vtanh.f32 %v660_v9  ;;  %v1663_v15 = vmul.f32 -1.442695, %v660_v9 }
0x118d   :  { %v657_v11 = vpop.f32.mrf.mxu0 }
0x118e   :  { %1968 = vpow2.f32 %v1663_v15 }
0x118f   :  { %v1819_v12 = vpop.f32.mrf.mxu0 }
0x1199   :  { %v1967_v14 = vpop.eup %1966 }
0x119a   :  { %670 = vrot.lane.b32.xlu1 %v1967_v14, %s2070_s20 }
0x119b   :  { %v1969_v16 = vpop.eup %1968 }
0x119c   :  { %v664_v17 = vadd.f32 1.0, %v1969_v16 }
0x119e   :  { %1970 = vrcp.f32 %v664_v17 }
0x11ab   :  { %v1971_v20 = vpop.eup %1970 }
0x11ac   :  { %v668_v22 = vmul.f32 %v1971_v20, %v606_v60 }
0x120c   :  { %v671_v21 = vpop.permute.xlu1 %670 }
0x120d   :  { %v673_v49 = vmul.f32 %v1971_v20, %v671_v21 }
0x120f   :  { %675 = vrot.lane.b32.xlu0 %v673_v49, %s2069_s15 }
0x1281   :  { %v676_v23 = vpop.permute.xlu0 %675 }
0x1282   :  { %v2285_v53 = vadd.f32 %v676_v23, %v668_v22 }
0x1284   :  { %1972 = vtanh.f32 %v2285_v53 }
0x1291   :  { %v1973_v31 = vpop.eup %1972 }
0x1292   :  { %681 = vrot.lane.b32.xlu1 %v1973_v31, %s2070_s20 }
0x1296   :  { %782 = vrot.lane.b32.xlu1 %v757_v32, %s2069_s15 }
0x1304   :  { %v682_v33 = vpop.permute.xlu1 %681 }
0x1305   :  { %v2305_v34 = vmul.f32 %v1971_v20, %v682_v33 }
0x1307   :  { %v685_v35 = vpack.c.bf16 %v2305_v34, %v2305_v34 }
0x1308   :  { %v783_v36 = vpop.permute.xlu1 %782 }
0x1309   :  { %687 = vrot.lane.b32.xlu0 %v685_v35, %s2069_s15  ;;  %1832 = vmatprep.mubr.msk.bf16.mxu0 %vm180_vm10, %v783_v36 }
0x130d   :  { %784 = vrot.lane.b32.xlu0 %v758_v37, %s2069_s15 }
0x1311   :  { %929 = vrot.lane.b32.xlu0 %v1672_v19, %s2069_s15 }
0x137b   :  { %v688_v41 = vpop.permute.xlu0 %687 }
0x137c   :  { %1825 = vmatmul.mubr.msk.bf16.vlgmr.msra.gmra.mxu1 %vm180_vm10, %v688_v41 }
0x137d   :  { %1841 = vmatpush3.bf16.msra.mxu1 %v2324_v40  ;;  %1844 = vmatprep.mubr.msk.bf16.mxu1 %vm2068_vm0, %v2067_v6 }
0x137e   :  { %1842 = vmatprep.subr.bf16.mxu1 %v2067_v6 }
0x137f   :  { %v785_v43 = vpop.permute.xlu0 %784 }
0x1380   :  { %1833 = vmatmul.mubr.msk.bf16.vlgmr.msra.gmra.mxu0 %vm180_vm10, %v785_v43 }
0x1381   :  { %1843 = vmatpush3.bf16.msra.mxu1 %v2334_v55  ;;  %1857 = vmatpush3.bf16.msra.mxu0 %v2324_v40 }
0x1382   :  { %1848 = vmatprep.subr.bf16.mxu1 %v2067_v6  ;;  %1858 = vmatprep.subr.bf16.mxu0 %v2067_v6 }
0x1383   :  { %v930_v8 = vpop.permute.xlu0 %929 }
0x1384   :  { %1845 = vmatmul.mubr.msk.bf16.vlgmr.msra.gmra.mxu1 %vm180_vm10, %v876_v45 }
0x1385   :  { %1849 = vmatpush3.bf16.msra.mxu1 %v2324_v40  ;;  %1852 = vmatprep.mubr.msk.bf16.mxu1 %vm2068_vm0, %v2067_v6 }
0x1386   :  { %1850 = vmatprep.subr.bf16.mxu1 %v2067_v6  ;;  %1859 = vmatpush3.bf16.msra.mxu0 %v2334_v55 }
0x1387   :  { %1872 = vmatprep.subr.bf16.mxu0 %v2067_v6 }
0x1389   :  { %1851 = vmatpush3.bf16.msra.mxu1 %v2334_v55 }
0x138a   :  { %1864 = vmatprep.subr.bf16.mxu1 %v2067_v6 }
0x143c   :  { %v726_v47 = vpop.f32.mrf.mxu1 }
0x143d   :  { %v732_v48 = vadd.f32 %v726_v47, %v2191_v57 }
0x143e   :  { %v1826_v50 = vpop.f32.mrf.mxu1 }
0x143f   :  { %v1665_v15 = vmul.f32 -1.442695, %v732_v48 }
0x1440   :  { %v729_v51 = vpop.f32.mrf.mxu1  ;;  %v2357_v52 = vpop.f32.mrf.mxu0 }
0x1442   :  { %v1827_v56 = vpop.f32.mrf.mxu1  ;;  %v836_v13 = vpop.f32.mrf.mxu0 }
0x1443   :  { %v837_v58 = vadd.f32 %v2362_v54, %v836_v13 }
0x1444   :  { %v914_v59 = vpop.f32.mrf.mxu1  ;;  %v2388_v33 = vpop.f32.mrf.mxu0 }
0x1445   :  { %v920_v61 = vadd.f32 %v914_v59, %v837_v58 }
0x1446   :  { %v1846_v46 = vpop.f32.mrf.mxu1  ;;  %v839_v35 = vpop.f32.mrf.mxu0 }
0x1447   :  { %1974 = vtanh.f32 %v920_v61  ;;  %v1674_v63 = vmul.f32 -1.442695, %v920_v61  ;;  %v840_v36 = vadd.f32 %v2362_v54, %v839_v35 }
0x1448   :  { %v917_v18 = vpop.f32.mrf.mxu1 }
0x1449   :  { %1976 = vpow2.f32 %v1674_v63 }
0x144a   :  { %v1847_v62 = vpop.f32.mrf.mxu1 }
0x1454   :  { %v1975_v57 = vpop.eup %1974 }
0x1455   :  { %934 = vrot.lane.b32.xlu1 %v1975_v57, %s2070_s20 }
0x1456   :  { %v1977_v60 = vpop.eup %1976 }
0x1457   :  { %v924_v2 = vadd.f32 1.0, %v1977_v60  ;;  %v845_v60 = vadd.f32 %v2357_v52, %v2362_v54 }
0x1459   :  { %1978 = vrcp.f32 %v924_v2 }
0x1466   :  { %v1979_v3 = vpop.eup %1978 }
0x1467   :  { %v932_v9 = vmul.f32 %v1979_v3, %v930_v8 }
0x14c7   :  { %v935_v5 = vpop.permute.xlu1 %934 }
0x14c8   :  { %v937_v7 = vmul.f32 %v1979_v3, %v935_v5 }
0x14ca   :  { %939 = vrot.lane.b32.xlu1 %v937_v7, %s2069_s15 }
0x153c   :  { %v940_v10 = vpop.permute.xlu1 %939 }
0x153d   :  { %v942_v11 = vadd.f32 %v940_v10, %v932_v9 }
0x153f   :  { %1980 = vtanh.f32 %v942_v11 }
0x1540   :  { %1982 = vtanh.f32 %v732_v48 }
0x1541   :  { %1984 = vpow2.f32 %v1665_v15 }
0x154c   :  { %v1981_v12 = vpop.eup %1980 }
0x154d   :  { %945 = vrot.lane.b32.xlu0 %v1981_v12, %s2070_s20  ;;  %v1983_v14 = vpop.eup %1982 }
0x154e   :  { %v1985_v16 = vpop.eup %1984 }
0x154f   :  { %v736_v17 = vadd.f32 1.0, %v1985_v16 }
0x1551   :  { %742 = vrot.lane.b32.xlu0 %v1983_v14, %s2070_s20  ;;  %1986 = vrcp.f32 %v736_v17 }
0x155e   :  { %v1987_v22 = vpop.eup %1986 }
0x155f   :  { %v740_v27 = vmul.f32 %v1987_v22, %v2285_v53  ;;  %v759_v53 = vpack.c.bf16 %v2276_v4, %v2260_v44 }
0x15bf   :  { %v946_v20 = vpop.permute.xlu0 %945 }
0x15c0   :  { %v2369_v21 = vmul.f32 %v1979_v3, %v946_v20 }
0x15c2   :  { %v949_v49 = vpack.c.bf16 %v2369_v21, %v2369_v21 }
0x15c3   :  { %v743_v23 = vpop.permute.xlu0 %742 }
0x15c4   :  { %v745_v25 = vmul.f32 %v1987_v22, %v743_v23  ;;  %951 = vrot.lane.b32.xlu1 %v949_v49, %s2069_s15 }
0x15c6   :  { %747 = vrot.lane.b32.xlu0 %v745_v25, %s2069_s15 }
0x1636   :  { %v952_v26 = vpop.permute.xlu1 %951 }
0x1637   :  { %1853 = vmatmul.mubr.msk.bf16.vlgmr.msra.gmra.mxu1 %vm180_vm10, %v952_v26 }
0x1638   :  { %v748_v28 = vpop.permute.xlu0 %747  ;;  %1865 = vmatpush3.bf16.msra.mxu1 %v2324_v40  ;;  %1868 = vmatprep.mubr.msk.bf16.mxu1 %vm2068_vm0, %v2067_v6 }
0x1639   :  { %v750_v29 = vadd.f32 %v748_v28, %v740_v27  ;;  %1866 = vmatprep.subr.bf16.mxu1 %v2067_v6  ;;  %v848_v27 = vadd.f32 %v2388_v33, %v2362_v54 }
0x163b   :  { %1988 = vtanh.f32 %v750_v29 }
0x163c   :  { %1867 = vmatpush3.bf16.msra.mxu1 %v2334_v55 }
0x163d   :  { %1880 = vmatprep.subr.bf16.mxu1 %v2067_v6 }
0x1648   :  { %v1989_v30 = vpop.eup %1988 }
0x1649   :  { %753 = vrot.lane.b32.xlu0 %v1989_v30, %s2070_s20 }
0x164d   :  { %786 = vrot.lane.b32.xlu0 %v759_v53, %s2069_s15 }
0x16bb   :  { %v754_v31 = vpop.permute.xlu0 %753 }
0x16bc   :  { %v756_v51 = vmul.f32 %v1987_v22, %v754_v31 }
0x16be   :  { %v760_v13 = vpack.c.bf16 %v756_v51, %v2305_v34 }
0x16bf   :  { %v787_v32 = vpop.permute.xlu0 %786 }
0x16c0   :  { %1836 = vmatprep.mubr.msk.bf16.mxu0 %vm180_vm10, %v787_v32 }
0x16f7   :  { %v990_v37 = vpop.f32.mrf.mxu1 }
0x16f8   :  { %v996_v19 = vadd.f32 %v990_v37, %v840_v36 }
0x16f9   :  { %v1854_v39 = vpop.f32.mrf.mxu1 }
0x16fa   :  { %1990 = vtanh.f32 %v996_v19  ;;  %v1676_v44 = vmul.f32 -1.442695, %v996_v19 }
0x16fb   :  { %v993_v38 = vpop.f32.mrf.mxu1 }
0x16fc   :  { %1992 = vpow2.f32 %v1676_v44 }
0x16fd   :  { %v1855_v1 = vpop.f32.mrf.mxu1 }
0x1707   :  { %v1991_v24 = vpop.eup %1990 }
0x1708   :  { %1006 = vrot.lane.b32.xlu1 %v1991_v24, %s2070_s20 }
0x1709   :  { %v1993_v4 = vpop.eup %1992 }
0x170a   :  { %v1000_v41 = vadd.f32 1.0, %v1993_v4 }
0x170c   :  { %1994 = vrcp.f32 %v1000_v41 }
0x1719   :  { %v1995_v42 = vpop.eup %1994 }
0x171a   :  { %v1004_v47 = vmul.f32 %v1995_v42, %v942_v11 }
0x177a   :  { %v1007_v43 = vpop.permute.xlu1 %1006 }
0x177b   :  { %v1009_v45 = vmul.f32 %v1995_v42, %v1007_v43 }
0x177d   :  { %1011 = vrot.lane.b32.xlu1 %v1009_v45, %s2069_s15 }
0x17ef   :  { %v1012_v48 = vpop.permute.xlu1 %1011 }
0x17f0   :  { %v1014_v50 = vadd.f32 %v1012_v48, %v1004_v47 }
0x17f2   :  { %1996 = vtanh.f32 %v1014_v50 }
0x17ff   :  { %v1997_v56 = vpop.eup %1996 }
0x1800   :  { %1017 = vrot.lane.b32.xlu1 %v1997_v56, %s2070_s20 }
0x1804   :  { %788 = vrot.lane.b32.xlu1 %v760_v13, %s2069_s15 }
0x1872   :  { %v1018_v58 = vpop.permute.xlu1 %1017 }
0x1873   :  { %v2396_v59 = vmul.f32 %v1995_v42, %v1018_v58 }
0x1875   :  { %v1021_v61 = vpack.c.bf16 %v2396_v59, %v2396_v59 }
0x1876   :  { %v789_v46 = vpop.permute.xlu1 %788 }
0x1877   :  { %1023 = vrot.lane.b32.xlu0 %v1021_v61, %s2069_s15  ;;  %1837 = vmatmul.mubr.msk.bf16.gmra.mxu0 %vm180_vm10, %v789_v46 }
0x1878   :  { %1860 = vmatprep.mubr.msk.bf16.mxu0 %vm2068_vm0, %v2067_v6 }
0x18e9   :  { %v1024_v18 = vpop.permute.xlu0 %1023 }
0x18ea   :  { %1861 = vmatmul.mubr.msk.bf16.vlgmr.msra.gmra.mxu0 %vm180_vm10, %v1024_v18 }
0x18eb   :  { %1873 = vmatpush3.bf16.msra.mxu0 %v2324_v40  ;;  %1876 = vmatprep.mubr.msk.bf16.mxu0 %vm2068_vm0, %v2067_v6 }
0x18ec   :  { %1874 = vmatprep.subr.bf16.mxu0 %v2067_v6 }
0x18ef   :  { %1875 = vmatpush3.bf16.msra.mxu0 %v2334_v55 }
0x18f0   :  { %1888 = vmatprep.subr.bf16.mxu0 %v2067_v6 }
0x1937   :  { %v2411_v34 = vpop.f32.mrf.mxu0 }
0x1939   :  { %v2413_v62 = vpop.f32.mrf.mxu0 }
0x193a   :  { %v853_v45 = vadd.f32 %v2362_v54, %v2413_v62 }
0x193b   :  { %v1839_v57 = vpop.f32.mrf.mxu0 }
0x193d   :  { %v2415_v63 = vpop.f32.mrf.mxu0 }
0x19aa   :  { %v1062_v2 = vpop.f32.mrf.mxu0 }
0x19ab   :  { %v1068_v3 = vadd.f32 %v1062_v2, %v845_v60 }
0x19ac   :  { %v1862_v5 = vpop.f32.mrf.mxu0 }
0x19ad   :  { %1998 = vtanh.f32 %v1068_v3  ;;  %v1678_v10 = vmul.f32 -1.442695, %v1068_v3 }
0x19ae   :  { %v1065_v7 = vpop.f32.mrf.mxu0 }
0x19af   :  { %2000 = vpow2.f32 %v1678_v10 }
0x19b0   :  { %v1863_v8 = vpop.f32.mrf.mxu0 }
0x19b1   :  { %v856_v8 = vadd.f32 %v2362_v54, %v2415_v63 }
0x19ba   :  { %v1999_v9 = vpop.eup %1998 }
0x19bb   :  { %1078 = vrot.lane.b32.xlu1 %v1999_v9, %s2070_s20 }
0x19bc   :  { %v2001_v11 = vpop.eup %2000 }
0x19bd   :  { %v1072_v12 = vadd.f32 1.0, %v2001_v11 }
0x19bf   :  { %2002 = vrcp.f32 %v1072_v12 }
0x19cc   :  { %v2003_v14 = vpop.eup %2002 }
0x19cd   :  { %v1076_v52 = vmul.f32 %v2003_v14, %v1014_v50 }
0x1a2d   :  { %v1079_v15 = vpop.permute.xlu1 %1078 }
0x1a2e   :  { %v1081_v16 = vmul.f32 %v2003_v14, %v1079_v15 }
0x1a30   :  { %1083 = vrot.lane.b32.xlu0 %v1081_v16, %s2069_s15 }
0x1aa2   :  { %v1084_v17 = vpop.permute.xlu0 %1083 }
0x1aa3   :  { %v1086_v20 = vadd.f32 %v1084_v17, %v1076_v52 }
0x1aa5   :  { %2004 = vtanh.f32 %v1086_v20 }
0x1ab2   :  { %v2005_v49 = vpop.eup %2004 }
0x1ab3   :  { %1089 = vrot.lane.b32.xlu1 %v2005_v49, %s2070_s20 }
0x1b25   :  { %v1090_v22 = vpop.permute.xlu1 %1089 }
0x1b26   :  { %v2422_v23 = vmul.f32 %v2003_v14, %v1090_v22 }
0x1b28   :  { %v1093_v25 = vpack.c.bf16 %v2422_v23, %v2422_v23 }
0x1b2a   :  { %1095 = vrot.lane.b32.xlu0 %v1093_v25, %s2069_s15 }
0x1b9c   :  { %v1096_v26 = vpop.permute.xlu0 %1095 }
0x1b9d   :  { %1869 = vmatmul.mubr.msk.bf16.vlgmr.msra.gmra.mxu1 %vm180_vm10, %v1096_v26 }
0x1b9e   :  { %1881 = vmatpush3.bf16.msra.mxu1 %v2324_v40  ;;  %1884 = vmatprep.mubr.msk.bf16.mxu1 %vm2068_vm0, %v2067_v6 }
0x1b9f   :  { %1882 = vmatprep.subr.bf16.mxu1 %v2067_v6 }
0x1ba2   :  { %1883 = vmatpush3.bf16.msra.mxu1 %v2334_v55 }
0x1c5d   :  { %v1134_v28 = vpop.f32.mrf.mxu1 }
0x1c5e   :  { %v1140_v29 = vadd.f32 %v1134_v28, %v848_v27 }
0x1c5f   :  { %v1870_v30 = vpop.f32.mrf.mxu1 }
0x1c60   :  { %2006 = vtanh.f32 %v1140_v29  ;;  %v1680_v35 = vmul.f32 -1.442695, %v1140_v29 }
0x1c61   :  { %v1137_v53 = vpop.f32.mrf.mxu1 }
0x1c62   :  { %2008 = vpow2.f32 %v1680_v35 }
0x1c63   :  { %v1871_v31 = vpop.f32.mrf.mxu1 }
0x1c64   :  { %v861_v31 = vadd.f32 %v2411_v34, %v2362_v54  ;;  %v1388_v54 = vpack.c.bf16 %v2396_v59, %v2369_v21  ;;  %v1381_v21 = vld [vmem:[%s2595_s2 + $0x10] sm:$0xff]  ;;  %v1382_v59 = vld [vmem:[%s2595_s2 + $0x18] sm:$0xff] }
0x1c6d   :  { %v2007_v32 = vpop.eup %2006 }
0x1c6e   :  { %1150 = vrot.lane.b32.xlu1 %v2007_v32, %s2070_s20 }
0x1c6f   :  { %v2009_v36 = vpop.eup %2008 }
0x1c70   :  { %v1144_v37 = vadd.f32 1.0, %v2009_v36 }
0x1c72   :  { %2010 = vrcp.f32 %v1144_v37 }
0x1c7f   :  { %v2011_v19 = vpop.eup %2010 }
0x1c80   :  { %v1148_v33 = vmul.f32 %v2011_v19, %v1086_v20 }
0x1ce0   :  { %v1151_v39 = vpop.permute.xlu1 %1150 }
0x1ce1   :  { %v1153_v38 = vmul.f32 %v2011_v19, %v1151_v39 }
0x1ce3   :  { %1155 = vrot.lane.b32.xlu0 %v1153_v38, %s2069_s15 }
0x1d55   :  { %v1156_v1 = vpop.permute.xlu0 %1155 }
0x1d56   :  { %v1158_v24 = vadd.f32 %v1156_v1, %v1148_v33 }
0x1d58   :  { %2012 = vtanh.f32 %v1158_v24 }
0x1d65   :  { %v2013_v44 = vpop.eup %2012 }
0x1d66   :  { %1161 = vrot.lane.b32.xlu1 %v2013_v44, %s2070_s20 }
0x1dd8   :  { %v1162_v4 = vpop.permute.xlu1 %1161 }
0x1dd9   :  { %v2438_v41 = vmul.f32 %v2011_v19, %v1162_v4 }
0x1ddb   :  { %v1165_v42 = vpack.c.bf16 %v2438_v41, %v2438_v41 }
0x1ddd   :  { %1167 = vrot.lane.b32.xlu0 %v1165_v42, %s2069_s15  ;;  %v1383_v42 = vld [vmem:[%s2595_s2 + $0x20] sm:$0xff] }
0x1e4f   :  { %v1168_v43 = vpop.permute.xlu0 %1167 }
0x1e50   :  { %1877 = vmatmul.mubr.msk.bf16.vlgmr.msra.gmra.mxu0 %vm180_vm10, %v1168_v43  ;;  %v1384_v43 = vld [vmem:[%s2595_s2 + $0x28] sm:$0xff] }
0x1e51   :  { %1889 = vmatpush3.bf16.msra.mxu0 %v2324_v40  ;;  %1892 = vmatprep.mubr.msk.bf16.mxu0 %vm2068_vm0, %v2067_v6 }
0x1e52   :  { %1890 = vmatprep.subr.bf16.mxu0 %v2067_v6 }
0x1e55   :  { %1891 = vmatpush3.bf16.msra.mxu0 %v2334_v55 }
0x1f10   :  { %v1206_v47 = vpop.f32.mrf.mxu0 }
0x1f11   :  { %v1212_v48 = vadd.f32 %v1206_v47, %v853_v45  ;;  %v1386_v45 = vpack.c.bf16 %v1384_v43, %v1383_v42  ;;  %v1570_v42 = vld [vmem:[%s2593_s0 + $0x10] sm:$0xff] }
0x1f12   :  { %v1878_v50 = vpop.f32.mrf.mxu0  ;;  %vm1577_vm12 = vcmp.gt.s32.totalorder %v1570_v42, 0 }
0x1f13   :  { %2014 = vtanh.f32 %v1212_v48  ;;  %v1682_v40 = vmul.f32 -1.442695, %v1212_v48  ;;  %1896 = vmatprep.subr.bf16.mxu1 %v1386_v45 }
0x1f14   :  { %v1209_v51 = vpop.f32.mrf.mxu0 }
0x1f15   :  { %2016 = vpow2.f32 %v1682_v40  ;;  %v1385_v51 = vpack.c.bf16 %v1382_v59, %v1381_v21  ;;  %v1389_v40 = vpack.c.bf16 %v2438_v41, %v2422_v23  ;;  %v1687_v23 = vld [vmem:[%s2595_s2 + $0x30] ss:$0 sm:$0xff]  ;;  %v1573_v21 = vld [vmem:[%s2593_s0 + $0x28] sm:$0xff] }
0x1f16   :  { %v1879_v56 = vpop.f32.mrf.mxu0  ;;  %vm1580_vm15 = vcmp.gt.s32.totalorder %v1573_v21, 0 }
0x1f20   :  { %v2015_v13 = vpop.eup %2014 }
0x1f21   :  { %1222 = vrot.lane.b32.xlu1 %v2015_v13, %s2070_s20 }
0x1f22   :  { %v2017_v58 = vpop.eup %2016 }
0x1f23   :  { %v1216_v61 = vadd.f32 1.0, %v2017_v58 }
0x1f25   :  { %2018 = vrcp.f32 %v1216_v61 }
0x1f32   :  { %v2019_v6 = vpop.eup %2018 }
0x1f33   :  { %v1220_v18 = vmul.f32 %v2019_v6, %v1158_v24 }
0x1f93   :  { %v1223_v46 = vpop.permute.xlu1 %1222 }
0x1f94   :  { %v1225_v55 = vmul.f32 %v2019_v6, %v1223_v46 }
0x1f96   :  { %1227 = vrot.lane.b32.xlu0 %v1225_v55, %s2069_s15 }
0x2008   :  { %v1228_v62 = vpop.permute.xlu0 %1227 }
0x2009   :  { %v1230_v57 = vadd.f32 %v1228_v62, %v1220_v18 }
0x200b   :  { %2020 = vtanh.f32 %v1230_v57 }
0x2018   :  { %v2021_v60 = vpop.eup %2020 }
0x2019   :  { %1233 = vrot.lane.b32.xlu1 %v2021_v60, %s2070_s20 }
0x208b   :  { %v1234_v2 = vpop.permute.xlu1 %1233 }
0x208c   :  { %v1236_v3 = vmul.f32 %v2019_v6, %v1234_v2 }
0x208e   :  { %v1237_v5 = vpack.c.bf16 %v1236_v3, %v1236_v3 }
0x2090   :  { %1239 = vrot.lane.b32.xlu0 %v1237_v5, %s2069_s15 }
0x2102   :  { %v1240_v7 = vpop.permute.xlu0 %1239 }
0x2103   :  { %1885 = vmatmul.mubr.msk.bf16.vlgmr.msra.gmra.mxu1 %vm180_vm10, %v1240_v7 }
0x2104   :  { %1897 = vmatpush3.bf16.msra.mxu1 %v1386_v45  ;;  %v1571_v45 = vld [vmem:[%s2593_s0 + $0x18] sm:$0xff] }
0x2105   :  { %1898 = vmatprep.subr.bf16.mxu1 %v1385_v51  ;;  %vm1578_vm13 = vcmp.gt.s32.totalorder %v1571_v45, 0 }
0x2108   :  { %1899 = vmatpush3.bf16.msra.mxu1 %v1385_v51  ;;  %v1587_v51 = vsel %vm1580_vm15, 1, %v2066_v0 }
0x21c3   :  { %v1278_v9 = vpop.f32.mrf.mxu1 }
0x21c4   :  { %v1284_v10 = vadd.f32 %v1278_v9, %v856_v8 }
0x21c5   :  { %v1886_v11 = vpop.f32.mrf.mxu1 }
0x21c6   :  { %2022 = vtanh.f32 %v1284_v10  ;;  %v1684_v16 = vmul.f32 -1.442695, %v1284_v10 }
0x21c7   :  { %v1281_v12 = vpop.f32.mrf.mxu1 }
0x21c8   :  { %2024 = vpow2.f32 %v1684_v16  ;;  %v2071_v12 = vmov 1  }
0x21c9   :  { %v1887_v14 = vpop.f32.mrf.mxu1  ;;  %1916 = vset.pattern.permute.xlu1 %v2071_v12  ;;  %1917 = vset.pattern.permute.xlu0 %v2071_v12 }
0x21d3   :  { %v2023_v15 = vpop.eup %2022 }
0x21d4   :  { %1294 = vrot.lane.b32.xlu1 %v2023_v15, %s2070_s20 }
0x21d5   :  { %v2025_v52 = vpop.eup %2024 }
0x21d6   :  { %v1288_v17 = vadd.f32 1.0, %v2025_v52 }
0x21d8   :  { %2026 = vrcp.f32 %v1288_v17 }
0x21e5   :  { %v2027_v20 = vpop.eup %2026 }
0x21e6   :  { %v1292_v63 = vmul.f32 %v2027_v20, %v1230_v57 }
0x2246   :  { %v1295_v49 = vpop.permute.xlu1 %1294 }
0x2247   :  { %v1297_v22 = vmul.f32 %v2027_v20, %v1295_v49 }
0x2249   :  { %1299 = vrot.lane.b32.xlu0 %v1297_v22, %s2069_s15 }
0x22bb   :  { %v1300_v25 = vpop.permute.xlu0 %1299 }
0x22bc   :  { %v1302_v26 = vadd.f32 %v1300_v25, %v1292_v63 }
0x22be   :  { %2028 = vtanh.f32 %v1302_v26 }
0x22cb   :  { %v2029_v27 = vpop.eup %2028 }
0x22cc   :  { %1305 = vrot.lane.b32.xlu1 %v2029_v27, %s2070_s20 }
0x233e   :  { %v1306_v28 = vpop.permute.xlu1 %1305 }
0x233f   :  { %v1308_v29 = vmul.f32 %v2027_v20, %v1306_v28 }
0x2341   :  { %v1309_v30 = vpack.c.bf16 %v1308_v29, %v1308_v29  ;;  %v1390_v34 = vpack.c.bf16 %v1308_v29, %v1236_v3 }
0x2343   :  { %1311 = vrot.lane.b32.xlu0 %v1309_v30, %s2069_s15 }
0x23b5   :  { %v1312_v53 = vpop.permute.xlu0 %1311 }
0x23b6   :  { %1893 = vmatmul.mubr.msk.bf16.vlgmr.msra.gmra.mxu0 %vm180_vm10, %v1312_v53 }
0x2476   :  { %v1350_v32 = vpop.f32.mrf.mxu0 }
0x2477   :  { %v1356_v35 = vadd.f32 %v1350_v32, %v861_v31 }
0x2478   :  { %v1894_v36 = vpop.f32.mrf.mxu0 }
0x2479   :  { %2030 = vtanh.f32 %v1356_v35  ;;  %v1686_v38 = vmul.f32 -1.442695, %v1356_v35 }
0x247a   :  { %v1353_v37 = vpop.f32.mrf.mxu0 }
0x247b   :  { %2032 = vpow2.f32 %v1686_v38 }
0x247c   :  { %v1895_v19 = vpop.f32.mrf.mxu0 }
0x2486   :  { %v2031_v39 = vpop.eup %2030 }
0x2487   :  { %1366 = vrot.lane.b32.xlu1 %v2031_v39, %s2070_s20 }
0x2488   :  { %v2033_v33 = vpop.eup %2032 }
0x2489   :  { %v1360_v1 = vadd.f32 1.0, %v2033_v33 }
0x248b   :  { %2034 = vrcp.f32 %v1360_v1 }
0x2498   :  { %v2035_v24 = vpop.eup %2034 }
0x2499   :  { %v1364_v47 = vmul.f32 %v2035_v24, %v1302_v26 }
0x24f9   :  { %v1367_v44 = vpop.permute.xlu1 %1366 }
0x24fa   :  { %v1369_v4 = vmul.f32 %v2035_v24, %v1367_v44 }
0x24fc   :  { %1371 = vrot.lane.b32.xlu0 %v1369_v4, %s2069_s15 }
0x2500   :  { %1400 = vrot.lane.b32.xlu0 %v1388_v54, %s2069_s15 }
0x2504   :  { %1404 = vrot.lane.b32.xlu0 %v1390_v34, %s2069_s15  ;;  %v1568_v34 = vld [vmem:[%s2593_s0] sm:$0xff] }
0x2505   :  { %vm1575_vm11 = vcmp.gt.s32.totalorder %v1568_v34, 0 }
0x2506   :  { %v1582_v43 = vsel %vm1575_vm11, 1, %v2066_v0 }
0x256e   :  { %v1372_v48 = vpop.permute.xlu0 %1371 }
0x256f   :  { %v1374_v50 = vadd.f32 %v1372_v48, %v1364_v47  ;;  %v1584_v47 = vsel %vm1577_vm12, 1, %v2066_v0  ;;  %v1572_v48 = vld [vmem:[%s2593_s0 + $0x20] sm:$0xff] }
0x2570   :  { %vm1579_vm14 = vcmp.gt.s32.totalorder %v1572_v48, 0 }
0x2571   :  { %2036 = vtanh.f32 %v1374_v50  ;;  %v1585_v50 = vsel %vm1578_vm13, 1, %v2066_v0  ;;  %v1586_v59 = vsel %vm1579_vm14, 1, %v2066_v0 }
0x2572   :  { %v1401_v56 = vpop.permute.xlu0 %1400 }
0x2573   :  { %1900 = vmatprep.mubr.msk.bf16.mxu1 %vm180_vm10, %v1401_v56 }
0x2576   :  { %v1405_v55 = vpop.permute.xlu0 %1404 }
0x257e   :  { %v2037_v13 = vpop.eup %2036 }
0x257f   :  { %1377 = vrot.lane.b32.xlu1 %v2037_v13, %s2070_s20 }
0x2583   :  { %1402 = vrot.lane.b32.xlu1 %v1389_v40, %s2069_s15 }
0x25f1   :  { %v1378_v58 = vpop.permute.xlu1 %1377 }
0x25f2   :  { %v1380_v61 = vmul.f32 %v2035_v24, %v1378_v58 }
0x25f4   :  { %v1391_v6 = vpack.c.bf16 %v1380_v61, %v1380_v61 }
0x25f5   :  { %v1403_v46 = vpop.permute.xlu1 %1402 }
0x25f6   :  { %1406 = vrot.lane.b32.xlu1 %v1391_v6, %s2069_s15  ;;  %1901 = vmatmul.mubr.msk.bf16.vlgmr.msra.gmra.mxu1 %vm180_vm10, %v1403_v46 }
0x25f7   :  { %1904 = vmatprep.mubr.msk.bf16.mxu1 %vm180_vm10, %v1405_v55 }
0x2668   :  { %v1407_v18 = vpop.permute.xlu1 %1406 }
0x2669   :  { %1905 = vmatmul.mubr.msk.bf16.gmra.mxu1 %vm180_vm10, %v1407_v18 }
0x26b6   :  { %v1902_v62 = vpop.f32.mrf.mxu1 }
0x26b7   :  { %v1463_v2 = vadd.f32 %v1902_v62, %v1687_v23 }
0x26b8   :  { %v1454_v41 = vpop.f32.mrf.mxu1 }
0x26b9   :  { %v1455_v57 = vadd.f32 %v1687_v23, %v1454_v41  ;;  %v1490_v10 = vsel %vm91_vm5, %v1463_v2, -inf }
0x26ba   :  { %v1903_v60 = vpop.f32.mrf.mxu1 }
0x26bb   :  { %v1484_v3 = vsel %vm91_vm5, %v1455_v57, -inf  ;;  %v1466_v8 = vadd.f32 %v1903_v60, %v1687_v23 }
0x26bc   :  { %v1457_v5 = vpop.f32.mrf.mxu1  ;;  %1485 = vmax.xlane.f32.xlu0 %v1484_v3  ;;  %v1574_v3 = vld [vmem:[%s2593_s0 + $0x30] sm:$0xff] }
0x26bd   :  { %v1458_v7 = vadd.f32 %v1687_v23, %v1457_v5  ;;  %v1493_v11 = vsel %vm91_vm5, %v1466_v8, -inf  ;;  %vm1581_vm0 = vcmp.gt.s32.totalorder %v1574_v3, 0 }
0x26be   :  { %v1588_v5 = vsel %vm1581_vm0, 1, %v2066_v0 }
0x26bf   :  { %v1487_v9 = vsel %vm91_vm5, %v1458_v7, -inf }
0x26c0   :  { %1488 = vmax.xlane.f32.xlu1 %v1487_v9  ;;  %1491 = vmax.xlane.f32.xlu0 %v1490_v10 }
0x26c4   :  { %1494 = vmax.xlane.f32.xlu0 %v1493_v11 }
0x2729   :  { %v1906_v14 = vpop.f32.mrf.mxu1 }
0x272a   :  { %v1479_v17 = vadd.f32 %v1906_v14, %v1687_v23 }
0x272b   :  { %v1470_v15 = vpop.f32.mrf.mxu1 }
0x272c   :  { %v1471_v16 = vadd.f32 %v1687_v23, %v1470_v15  ;;  %v1502_v63 = vsel %vm91_vm5, %v1479_v17, -inf }
0x272d   :  { %v1907_v52 = vpop.f32.mrf.mxu1 }
0x272e   :  { %v1496_v20 = vsel %vm91_vm5, %v1471_v16, -inf }
0x272f   :  { %v1473_v49 = vpop.f32.mrf.mxu1  ;;  %1497 = vmax.xlane.f32.xlu1 %v1496_v20 }
0x2730   :  { %v1474_v22 = vadd.f32 %v1687_v23, %v1473_v49 }
0x2732   :  { %v1499_v25 = vsel %vm91_vm5, %v1474_v22, -inf }
0x2733   :  { %1503 = vmax.xlane.f32.xlu1 %v1502_v63  ;;  %1500 = vmax.xlane.f32.xlu0 %v1499_v25 }
0x2745   :  { %v1486_v26 = vpop.xlane.xlu0 %1485 }
0x2746   :  { %v2502_v27 = vsub.f32 %v1455_v57, %v1486_v26 }
0x2748   :  { %v1512_v28 = vmul.f32 1.442695, %v2502_v27 }
0x2749   :  { %v1489_v29 = vpop.xlane.xlu1 %1488  ;;  %v1492_v30 = vpop.xlane.xlu0 %1491 }
0x274a   :  { %2038 = vpow2.f32 %v1512_v28  ;;  %v2505_v53 = vsub.f32 %v1458_v7, %v1489_v29  ;;  %v2507_v31 = vsub.f32 %v1463_v2, %v1492_v30  ;;  %v1569_v7 = vld [vmem:[%s2593_s0 + $0x8] sm:$0xff] }
0x274b   :  { %vm1576_vm1 = vcmp.gt.s32.totalorder %v1569_v7, 0 }
0x274c   :  { %v1514_v32 = vmul.f32 1.442695, %v2505_v53  ;;  %v1516_v35 = vmul.f32 1.442695, %v2507_v31  ;;  %v1583_v11 = vsel %vm1576_vm1, 1, %v2066_v0 }
0x274d   :  { %v1495_v36 = vpop.xlane.xlu0 %1494 }
0x274e   :  { %2040 = vpow2.f32 %v1514_v32  ;;  %v2511_v37 = vsub.f32 %v1466_v8, %v1495_v36 }
0x274f   :  { %2042 = vpow2.f32 %v1516_v35 }
0x2750   :  { %v1518_v19 = vmul.f32 1.442695, %v2511_v37 }
0x2752   :  { %2044 = vpow2.f32 %v1518_v19 }
0x2757   :  { %v2039_v39 = vpop.eup %2038 }
0x2758   :  { %v1526_v38 = vsel %vm91_vm5, %v2039_v39, 0.0 }
0x2759   :  { %1527 = vadd.xlane.f32.xlu0 %v1526_v38 }
0x275b   :  { %v2041_v33 = vpop.eup %2040 }
0x275c   :  { %v2043_v1 = vpop.eup %2042  ;;  %v1529_v24 = vsel %vm91_vm5, %v2041_v33, 0.0 }
0x275d   :  { %1530 = vadd.xlane.f32.xlu1 %v1529_v24  ;;  %v1532_v44 = vsel %vm91_vm5, %v2043_v1, 0.0 }
0x275e   :  { %1533 = vadd.xlane.f32.xlu0 %v1532_v44 }
0x275f   :  { %v2045_v4 = vpop.eup %2044 }
0x2760   :  { %v1535_v54 = vsel %vm91_vm5, %v2045_v4, 0.0 }
0x2761   :  { %1536 = vadd.xlane.f32.xlu1 %v1535_v54 }
0x2772   :  { %1590 = vperm.xlu1 %1916, %v1582_v43  }
0x2776   :  { %1596 = vperm.xlu1 %1916, %v1584_v47  }
0x277a   :  { %1599 = vperm.xlu1 %1916, %v1585_v50  }
0x277e   :  { %1602 = vperm.xlu1 %1916, %v1586_v59  }
0x2782   :  { %1605 = vperm.xlu1 %1916, %v1587_v51  }
0x27b8   :  { %v1498_v56 = vpop.xlane.xlu1 %1497 }
0x27b9   :  { %v2538_v13 = vsub.f32 %v1471_v16, %v1498_v56 }
0x27bb   :  { %v1520_v46 = vmul.f32 1.442695, %v2538_v13 }
0x27bc   :  { %v1504_v40 = vpop.xlane.xlu1 %1503  ;;  %v1501_v58 = vpop.xlane.xlu0 %1500 }
0x27bd   :  { %v2540_v61 = vsub.f32 %v1479_v17, %v1504_v40  ;;  %v2542_v6 = vsub.f32 %v1474_v22, %v1501_v58 }
0x27bf   :  { %v1524_v55 = vmul.f32 1.442695, %v2540_v61  ;;  %v1522_v18 = vmul.f32 1.442695, %v2542_v6 }
0x27c1   :  { %2046 = vpow2.f32 %v1524_v55 }
0x27c2   :  { %2048 = vpow2.f32 %v1522_v18 }
0x27c3   :  { %2050 = vpow2.f32 %v1520_v46 }
0x27ce   :  { %v2047_v62 = vpop.eup %2046 }
0x27cf   :  { %v2049_v23 = vpop.eup %2048  ;;  %v1544_v41 = vsel %vm91_vm5, %v2047_v62, 0.0 }
0x27d0   :  { %v2051_v57 = vpop.eup %2050  ;;  %1545 = vadd.xlane.f32.xlu0 %v1544_v41  ;;  %v1541_v60 = vsel %vm91_vm5, %v2049_v23, 0.0 }
0x27d1   :  { %1542 = vadd.xlane.f32.xlu1 %v1541_v60  ;;  %v1538_v2 = vsel %vm91_vm5, %v2051_v57, 0.0 }
0x27d4   :  { %1539 = vadd.xlane.f32.xlu0 %v1538_v2 }
0x27e2   :  { %1608 = vperm.xlu1 %1916, %v1588_v5   ;;  %v1528_v8 = vpop.xlane.xlu0 %1527 }
0x27e3   :  { %2052 = vlog2.f32 %v1528_v8 }
0x27e6   :  { %v1531_v9 = vpop.xlane.xlu1 %1530 }
0x27e7   :  { %v1534_v10 = vpop.xlane.xlu0 %1533 }
0x27e8   :  { %2054 = vlog2.f32 %v1534_v10 }
0x27ea   :  { %1593 = vperm.xlu0 %1917, %v1583_v11   ;;  %v1537_v12 = vpop.xlane.xlu1 %1536 }
0x27eb   :  { %2056 = vlog2.f32 %v1537_v12 }
0x27ec   :  { %2058 = vlog2.f32 %v1531_v9 }
0x27ee   :  { %v1591_v14 = vpop.permute.xlu1 %1590 }
0x27ef   :  { %vm1610_vm2 = vcmp.eq.s32.totalorder %v1591_v14, 1 }
0x27f0   :  { %v2053_v15 = vpop.eup %2052 }
0x27f1   :  { %v1548_v16 = vmul.f32 0.6931472, %v2053_v15 }
0x27f2   :  { %v1597_v52 = vpop.permute.xlu1 %1596 }
0x27f3   :  { %v1561_v17 = vsub.f32 %v2502_v27, %v1548_v16  ;;  %vm1612_vm3 = vcmp.eq.s32.totalorder %v1597_v52, 1 }
0x27f5   :  { %v2055_v20 = vpop.eup %2054  ;;  %v1617_v49 = vsel %vm1610_vm2, %v1561_v17, 0.0 }
0x27f6   :  { %v1552_v22 = vmul.f32 0.6931472, %v2055_v20  ;;  %1624 = vst.msk [vmem:[%s2596_s3] sm:$0xff] %vm91_vm5, %v1617_v49  ;;  %v1600_v0 = vpop.permute.xlu1 %1599 }
0x27f7   :  { %vm1613_vm4 = vcmp.eq.s32.totalorder %v1600_v0, 1 }
0x27f8   :  { %v2057_v63 = vpop.eup %2056  ;;  %v1563_v25 = vsub.f32 %v2507_v31, %v1552_v22 }
0x27f9   :  { %v1554_v26 = vmul.f32 0.6931472, %v2057_v63  ;;  %v2059_v19 = vpop.eup %2058 }
0x27fa   :  { %v1619_v28 = vsel %vm1612_vm3, %v1563_v25, 0.0  ;;  %v1603_v30 = vpop.permute.xlu1 %1602  ;;  %v1550_v39 = vmul.f32 0.6931472, %v2059_v19 }
0x27fb   :  { %1626 = vst.msk [vmem:[%s2596_s3 + $0x10] sm:$0xff] %vm91_vm5, %v1619_v28  ;;  %v1564_v27 = vsub.f32 %v2511_v37, %v1554_v26  ;;  %vm1614_vm9 = vcmp.eq.s32.totalorder %v1603_v30, 1 }
0x27fc   :  { %v1562_v38 = vsub.f32 %v2505_v53, %v1550_v39 }
0x27fd   :  { %v1620_v29 = vsel %vm1613_vm4, %v1564_v27, 0.0 }
0x27fe   :  { %1627 = vst.msk [vmem:[%s2596_s3 + $0x18] sm:$0xff] %vm91_vm5, %v1620_v29  ;;  %v1606_v32 = vpop.permute.xlu1 %1605 }
0x27ff   :  { %vm1615_vm8 = vcmp.eq.s32.totalorder %v1606_v32, 1 }
0x2859   :  { %v1546_v31 = vpop.xlane.xlu0 %1545 }
0x285a   :  { %v1543_v35 = vpop.xlane.xlu1 %1542  ;;  %2060 = vlog2.f32 %v1546_v31 }
0x285b   :  { %2062 = vlog2.f32 %v1543_v35 }
0x285d   :  { %v1540_v36 = vpop.xlane.xlu0 %1539 }
0x285e   :  { %2064 = vlog2.f32 %v1540_v36  ;;  %v1609_v4 = vpop.permute.xlu1 %1608 }
0x285f   :  { %vm1616_vm7 = vcmp.eq.s32.totalorder %v1609_v4, 1 }
0x2865   :  { %v1594_v37 = vpop.permute.xlu0 %1593 }
0x2866   :  { %vm1611_vm6 = vcmp.eq.s32.totalorder %v1594_v37, 1 }
0x2867   :  { %v2061_v33 = vpop.eup %2060  ;;  %v1618_v1 = vsel %vm1611_vm6, %v1562_v38, 0.0 }
0x2868   :  { %v2063_v24 = vpop.eup %2062  ;;  %v1560_v44 = vmul.f32 0.6931472, %v2061_v33  ;;  %1625 = vst.msk [vmem:[%s2596_s3 + $0x8] sm:$0xff] %vm91_vm5, %v1618_v1 }
0x2869   :  { %v1558_v54 = vmul.f32 0.6931472, %v2063_v24 }
0x286a   :  { %v1567_v34 = vsub.f32 %v2540_v61, %v1560_v44 }
0x286b   :  { %v2065_v42 = vpop.eup %2064  ;;  %v1566_v43 = vsub.f32 %v2542_v6, %v1558_v54 }
0x286c   :  { %v1623_v53 = vsel %vm1616_vm7, %v1567_v34, 0.0  ;;  %v1556_v45 = vmul.f32 0.6931472, %v2065_v42 }
0x286d   :  { %v1622_v47 = vsel %vm1615_vm8, %v1566_v43, 0.0  ;;  %1630 = vst.msk [vmem:[%s2596_s3 + $0x30] sm:$0xff] %vm91_vm5, %v1623_v53 }
0x286e   :  { %1629 = vst.msk [vmem:[%s2596_s3 + $0x28] sm:$0xff] %vm91_vm5, %v1622_v47  ;;  %v1565_v48 = vsub.f32 %v2538_v13, %v1556_v45 }
0x2870   :  { %v1621_v50 = vsel %vm1614_vm9, %v1565_v48, 0.0 }
0x2871   :  { %1628 = vst.msk [vmem:[%s2596_s3 + $0x20] sm:$0xff] %vm91_vm5, %v1621_v50 }

</bundles_post_ra>
